<compile_context>
chip_gen: v7x
topology: tpu7x:2x2x1
jax: 0.10.0
libtpu: 0.0.40
codegen_flags: <defaults>
</compile_context>

<pallas_src>
import math
import functools

import jax
import jax.numpy as jnp
from jax import lax
from jax.experimental import pallas as pl
from jax.experimental.pallas import tpu as pltpu

LN_EPS = 1e-5


# ----------------------------- in-kernel helpers -----------------------------

def _layernorm(x, g, b):
    mu = jnp.mean(x, axis=-1, keepdims=True)
    var = jnp.mean((x - mu) ** 2, axis=-1, keepdims=True)
    return (x - mu) * lax.rsqrt(var + LN_EPS) * g + b


def _gelu(x):
    # TODO(synk): torch nn.GELU default is the exact erf GELU; tanh
    # approximation used here for robust Mosaic lowering (difference ~1e-3).
    c = math.sqrt(2.0 / math.pi)
    return 0.5 * x * (1.0 + jnp.tanh(c * (x + 0.044715 * x * x * x)))


# ----------------------------- fused forward kernel --------------------------

def fused_gpt_kernel(tok_ref, pos_ref,
                     ln1g_ref, ln1b_ref, wqkv_ref, bqkv_ref,
                     wo_ref, bo_ref, ln2g_ref, ln2b_ref,
                     w1_ref, b1_ref, w2_ref, b2_ref,
                     lng_ref, lnb_ref, wh_ref, bh_ref,
                     out_ref, *, num_layers, num_heads):
    B, S, E = tok_ref.shape
    H = num_heads
    hd = E // H

    # token + reversed positional embedding, flattened to (B*S, E)
    x = (tok_ref[...] + pos_ref[...]).reshape(B * S, E)

    # causal mask: 0 on/below diagonal, -inf above (same as torch's
    # generate_square_subsequent_mask). Diagonal is always unmasked so the
    # row max stays finite.
    row = lax.broadcasted_iota(jnp.int32, (S, S), 0)
    col = lax.broadcasted_iota(jnp.int32, (S, S), 1)
    mask = jnp.where(col <= row, 0.0, -jnp.inf).astype(jnp.float32)   # (S, S)

    for l in range(num_layers):                                       # static unroll
        # --- pre-norm + fused QKV projection (single matmul) ---
        h = _layernorm(x, ln1g_ref[l], ln1b_ref[l])                   # (B*S, E)
        qkv = jnp.dot(h, wqkv_ref[l],
                      preferred_element_type=jnp.float32) + bqkv_ref[l]   # (B*S, 3E)
        # 1/sqrt(head_size) already folded into the Q columns/bias.
        q3 = qkv[:, :E].reshape(B, S, E)
        k3 = qkv[:, E:2 * E].reshape(B, S, E)
        v3 = qkv[:, 2 * E:].reshape(B, S, E)

        # --- per-head causal attention (scores are inherently per-head) ---
        ctx_heads = []
        for hh in range(H):
            sl = slice(hh * hd, (hh + 1) * hd)
            qh, kh, vh = q3[:, :, sl], k3[:, :, sl], v3[:, :, sl]     # (B, S, hd)
            s = jnp.einsum('bqd,bkd->bqk', qh, kh,
                           preferred_element_type=jnp.float32)        # (B, S, S)
            s = s + mask[None, :, :]
            s = s - jnp.max(s, axis=-1, keepdims=True)
            e = jnp.exp(s)
            p = e * pl.reciprocal(jnp.sum(e, axis=-1, keepdims=True), approx=True)
            ctx_heads.append(jnp.einsum('bqk,bkd->bqd', p, vh,
                                        preferred_element_type=jnp.float32))
        # "concat heads" + out_proj as ONE lane-dense (B*S,E)x(E,E) matmul
        ctx = jnp.concatenate(ctx_heads, axis=-1).reshape(B * S, E)
        attn = jnp.dot(ctx, wo_ref[l],
                       preferred_element_type=jnp.float32) + bo_ref[l]
        x = x + attn                                                  # residual 1

        # --- pre-norm + feed-forward (E -> 4E -> E, GELU) ---
        h2 = _layernorm(x, ln2g_ref[l], ln2b_ref[l])
        f = jnp.dot(h2, w1_ref[l], preferred_element_type=jnp.float32) + b1_ref[l]
        f = _gelu(f)
        f = jnp.dot(f, w2_ref[l], preferred_element_type=jnp.float32) + b2_ref[l]
        x = x + f                                                     # residual 2

    # --- final LayerNorm + LM head on each sequence's last token (M = B) ---
    x3 = x.reshape(B, S, E)
    h_last = _layernorm(x3[:, S - 1, :], lng_ref[...], lnb_ref[...])  # (B, E)
    out_ref[...] = jnp.dot(h_last, wh_ref[...],
                           preferred_element_type=jnp.float32) + bh_ref[...]


def fused_forward(tok, pos, prep, num_heads):
    B, S, E = tok.shape
    L = prep["w1"].shape[0]
    Vp = prep["w_head"].shape[1]

    weights = (pos,
               prep["ln1_g"], prep["ln1_b"], prep["wqkv"], prep["bqkv"],
               prep["wo"], prep["bo"], prep["ln2_g"], prep["ln2_b"],
               prep["w1"], prep["b1"], prep["w2"], prep["b2"],
               prep["lm_g"], prep["lm_b"], prep["w_head"], prep["b_head"])

    # Single grid step: batch folded into the matmul M dimension (no serial
    # per-batch loop overhead on single-TC v5e/v6e; re-evaluate a "parallel"
    # batch split on v7x once per-step work is large enough).
    in_specs = [pl.BlockSpec(tok.shape, lambda i: (0, 0, 0))]
    in_specs += [pl.BlockSpec(w.shape, lambda i, n=w.ndim: (0,) * n)
                 for w in weights]

    kernel = functools.partial(fused_gpt_kernel, num_layers=L,
                               num_heads=num_heads)
    return pl.pallas_call(
        kernel,
        out_shape=jax.ShapeDtypeStruct((B, Vp), jnp.float32),
        grid=(1,),
        in_specs=in_specs,
        out_specs=pl.BlockSpec((B, Vp), lambda i: (0, 0)),
        compiler_params=pltpu.CompilerParams(
            dimension_semantics=("arbitrary",)),
    )(tok, *weights)


# ----------------------------- one-time weight prep ---------------------------

def prepare_weights(params, num_heads):
    """Stack per-layer weights, fuse QKV (+ fold the 1/sqrt(hd) scale into Q),
    and pad the LM head to a lane-dense 128-wide vocab. Run ONCE at init."""
    layers = params["layers"]
    E = layers[0]["wq"].shape[0]
    hd = E // num_heads
    scale = 1.0 / math.sqrt(hd)
    V = params["w_head"].shape[1]
    Vp = ((V + 127) // 128) * 128

    def per_layer(name):
        return jnp.stack([l[name] for l in layers])

    wqkv = jnp.stack([jnp.concatenate([l["wq"] * scale, l["wk"], l["wv"]], axis=1)
                      for l in layers])                        # (L, E, 3E)
    bqkv = jnp.stack([jnp.concatenate([l["bq"] * scale, l["bk"], l["bv"]], axis=1)
                      for l in layers])                        # (L, 1, 3E)

    w_head_p = jnp.zeros((E, Vp), jnp.float32).at[:, :V].set(params["w_head"])
    b_head_p = jnp.zeros((1, Vp), jnp.float32).at[:, :V].set(params["b_head"])

    return {
        "embed_word": params["embed_word"], "embed_pos": params["embed_pos"],
        "ln1_g": per_layer("ln1_g"), "ln1_b": per_layer("ln1_b"),
        "wqkv": wqkv, "bqkv": bqkv,
        "wo": per_layer("wo"), "bo": per_layer("bo"),
        "ln2_g": per_layer("ln2_g"), "ln2_b": per_layer("ln2_b"),
        "w1": per_layer("w1"), "b1": per_layer("b1"),
        "w2": per_layer("w2"), "b2": per_layer("b2"),
        "lm_g": params["lm_g"], "lm_b": params["lm_b"],
        "w_head": w_head_p, "b_head": b_head_p,
    }


# ----------------------------- parameter init --------------------------------

def _xavier(key, fan_in, fan_out):
    std = math.sqrt(2.0 / (fan_in + fan_out))
    return jax.random.normal(key, (fan_in, fan_out), jnp.float32) * std


def _bias(key, fan_in, size):
    bound = 1.0 / math.sqrt(fan_in)
    return jax.random.uniform(key, (1, size), jnp.float32, -bound, bound)


def init_params(key, vocab, E, num_layers, max_seqlen):
    H4 = 4 * E
    keys = iter(jax.random.split(key, 4 + num_layers * 12))
    params = {
        "embed_word": _xavier(next(keys), vocab, E),        # (V, E)
        "embed_pos": _xavier(next(keys), max_seqlen, E),    # (max_seqlen, E)
        "lm_g": jnp.ones((1, E), jnp.float32),
        "lm_b": jnp.zeros((1, E), jnp.float32),
        "w_head": _xavier(next(keys), E, vocab),
        "b_head": _bias(next(keys), E, vocab),
        "layers": [],
    }
    for _ in range(num_layers):
        params["layers"].append({
            "ln1_g": jnp.ones((1, E), jnp.float32),
            "ln1_b": jnp.zeros((1, E), jnp.float32),
            "wq": _xavier(next(keys), E, E), "bq": _bias(next(keys), E, E),
            "wk": _xavier(next(keys), E, E), "bk": _bias(next(keys), E, E),
            "wv": _xavier(next(keys), E, E), "bv": _bias(next(keys), E, E),
            "wo": _xavier(next(keys), E, E), "bo": _bias(next(keys), E, E),
            "ln2_g": jnp.ones((1, E), jnp.float32),
            "ln2_b": jnp.zeros((1, E), jnp.float32),
            "w1": _xavier(next(keys), E, H4), "b1": _bias(next(keys), E, H4),
            "w2": _xavier(next(keys), H4, E), "b2": _bias(next(keys), H4, E),
        })
    return params


# ----------------------------- hot-path forward -------------------------------

@functools.partial(jax.jit, static_argnames=("num_heads", "vocab"))
def model_forward(src, prep, *, num_heads, vocab):
    # src: int32 [B, S].  Dropout is treated as inference-mode identity.
    B, S = src.shape
    tok = prep["embed_word"][src]                            # (B, S, E) gather (glue)
    pos_ids = jnp.flip(jnp.arange(S), axis=0)                # torch.flip(arange)
    pos = prep["embed_pos"][pos_ids]                         # (S, E)
    logits_p = fused_forward(tok, pos, prep, num_heads)      # (B, Vpad)
    return logits_p[:, :vocab]                               # (B, V) last-token logits


# ----------------------------- main -------------------------------------------

if __name__ == "__main__":
    VOCAB = 64
    EMBED = 32
    NUM_LAYERS = 2
    NUM_HEADS = 4
    MAX_SEQLEN = 64
    BATCH = 2
    SEQ = 8

    root = jax.random.PRNGKey(0)
    k_params, k_src = jax.random.split(root)
    params = init_params(k_params, VOCAB, EMBED, NUM_LAYERS, MAX_SEQLEN)
    prep = prepare_weights(params, NUM_HEADS)                # one-time weight prep
    prep = jax.tree_util.tree_map(jax.block_until_ready, prep)
    src = jax.random.randint(k_src, (BATCH, SEQ), 0, VOCAB, dtype=jnp.int32)

    logits = model_forward(src, prep, num_heads=NUM_HEADS, vocab=VOCAB)
    jax.block_until_ready(logits)
    assert logits.shape == (BATCH, VOCAB)
    assert bool(jnp.all(jnp.isfinite(logits)))
    print("KERNEL_OK")
</pallas_src>

<mosaic_0001>
module attributes {stable_mosaic.version = 11 : i64} {
  func.func @fused_gpt_kernel(%arg0: i32, %arg1: memref<2x8x32xf32, #tpu.memory_space<vmem>>, %arg2: memref<8x32xf32, #tpu.memory_space<vmem>>, %arg3: memref<2x1x32xf32, #tpu.memory_space<vmem>>, %arg4: memref<2x1x32xf32, #tpu.memory_space<vmem>>, %arg5: memref<2x32x96xf32, #tpu.memory_space<vmem>>, %arg6: memref<2x1x96xf32, #tpu.memory_space<vmem>>, %arg7: memref<2x32x32xf32, #tpu.memory_space<vmem>>, %arg8: memref<2x1x32xf32, #tpu.memory_space<vmem>>, %arg9: memref<2x1x32xf32, #tpu.memory_space<vmem>>, %arg10: memref<2x1x32xf32, #tpu.memory_space<vmem>>, %arg11: memref<2x32x128xf32, #tpu.memory_space<vmem>>, %arg12: memref<2x1x128xf32, #tpu.memory_space<vmem>>, %arg13: memref<2x128x32xf32, #tpu.memory_space<vmem>>, %arg14: memref<2x1x32xf32, #tpu.memory_space<vmem>>, %arg15: memref<1x32xf32, #tpu.memory_space<vmem>>, %arg16: memref<1x32xf32, #tpu.memory_space<vmem>>, %arg17: memref<32x128xf32, #tpu.memory_space<vmem>>, %arg18: memref<1x128xf32, #tpu.memory_space<vmem>>, %arg19: memref<2x128xf32, #tpu.memory_space<vmem>>) attributes {dimension_semantics = [#tpu.dimension_semantics<arbitrary>], iteration_bounds = array<i64: 1>, scalar_prefetch = 0 : i64, scratch_operands = 0 : i64, tpu.core_type = #tpu.core_type<tc>, window_params = [{pipeline_mode = #tpu.pipeline_mode<synchronous>, transform_indices = @transform_0, window_bounds = array<i64: 2, 8, 32>}, {pipeline_mode = #tpu.pipeline_mode<synchronous>, transform_indices = @transform_1, window_bounds = array<i64: 8, 32>}, {pipeline_mode = #tpu.pipeline_mode<synchronous>, transform_indices = @transform_2, window_bounds = array<i64: 2, 1, 32>}, {pipeline_mode = #tpu.pipeline_mode<synchronous>, transform_indices = @transform_3, window_bounds = array<i64: 2, 1, 32>}, {pipeline_mode = #tpu.pipeline_mode<synchronous>, transform_indices = @transform_4, window_bounds = array<i64: 2, 32, 96>}, {pipeline_mode = #tpu.pipeline_mode<synchronous>, transform_indices = @transform_5, window_bounds = array<i64: 2, 1, 96>}, {pipeline_mode = #tpu.pipeline_mode<synchronous>, transform_indices = @transform_6, window_bounds = array<i64: 2, 32, 32>}, {pipeline_mode = #tpu.pipeline_mode<synchronous>, transform_indices = @transform_7, window_bounds = array<i64: 2, 1, 32>}, {pipeline_mode = #tpu.pipeline_mode<synchronous>, transform_indices = @transform_8, window_bounds = array<i64: 2, 1, 32>}, {pipeline_mode = #tpu.pipeline_mode<synchronous>, transform_indices = @transform_9, window_bounds = array<i64: 2, 1, 32>}, {pipeline_mode = #tpu.pipeline_mode<synchronous>, transform_indices = @transform_10, window_bounds = array<i64: 2, 32, 128>}, {pipeline_mode = #tpu.pipeline_mode<synchronous>, transform_indices = @transform_11, window_bounds = array<i64: 2, 1, 128>}, {pipeline_mode = #tpu.pipeline_mode<synchronous>, transform_indices = @transform_12, window_bounds = array<i64: 2, 128, 32>}, {pipeline_mode = #tpu.pipeline_mode<synchronous>, transform_indices = @transform_13, window_bounds = array<i64: 2, 1, 32>}, {pipeline_mode = #tpu.pipeline_mode<synchronous>, transform_indices = @transform_14, window_bounds = array<i64: 1, 32>}, {pipeline_mode = #tpu.pipeline_mode<synchronous>, transform_indices = @transform_15, window_bounds = array<i64: 1, 32>}, {pipeline_mode = #tpu.pipeline_mode<synchronous>, transform_indices = @transform_16, window_bounds = array<i64: 32, 128>}, {pipeline_mode = #tpu.pipeline_mode<synchronous>, transform_indices = @transform_17, window_bounds = array<i64: 1, 128>}, {pipeline_mode = #tpu.pipeline_mode<synchronous>, transform_indices = @transform_18, window_bounds = array<i64: 2, 128>}]} {
    %c0 = arith.constant 0 : index
    %c0_0 = arith.constant 0 : index
    %c0_1 = arith.constant 0 : index
    %0 = vector.load %arg1[%c0, %c0_0, %c0_1] : memref<2x8x32xf32, #tpu.memory_space<vmem>>, vector<2x8x32xf32>
    %c0_2 = arith.constant 0 : index
    %c0_3 = arith.constant 0 : index
    %1 = vector.load %arg2[%c0_2, %c0_3] : memref<8x32xf32, #tpu.memory_space<vmem>>, vector<8x32xf32>
    %2 = vector.shape_cast %1 : vector<8x32xf32> to vector<1x8x32xf32>
    %3 = vector.broadcast %2 : vector<1x8x32xf32> to vector<2x8x32xf32>
    %4 = arith.addf %0, %3 : vector<2x8x32xf32>
    %5 = vector.shape_cast %4 : vector<2x8x32xf32> to vector<16x32xf32>
    %6 = tpu.iota {dimensions = array<i32: 0>} : vector<8x8xi32>
    %7 = tpu.iota {dimensions = array<i32: 1>} : vector<8x8xi32>
    %8 = arith.cmpi sle, %7, %6 : vector<8x8xi32>
    %cst = arith.constant 0.000000e+00 : f32
    %cst_4 = arith.constant 0xFF800000 : f32
    %9 = vector.broadcast %cst : f32 to vector<8x8xf32>
    %10 = vector.broadcast %cst_4 : f32 to vector<8x8xf32>
    %11 = arith.select %8, %9, %10 : vector<8x8xi1>, vector<8x8xf32>
    %c0_5 = arith.constant 0 : index
    %c0_6 = arith.constant 0 : index
    %c0_7 = arith.constant 0 : index
    %12 = vector.load %arg3[%c0_5, %c0_6, %c0_7] : memref<2x1x32xf32, #tpu.memory_space<vmem>>, vector<1x1x32xf32>
    %13 = vector.shape_cast %12 : vector<1x1x32xf32> to vector<1x32xf32>
    %c0_8 = arith.constant 0 : index
    %c0_9 = arith.constant 0 : index
    %c0_10 = arith.constant 0 : index
    %14 = vector.load %arg4[%c0_8, %c0_9, %c0_10] : memref<2x1x32xf32, #tpu.memory_space<vmem>>, vector<1x1x32xf32>
    %15 = vector.shape_cast %14 : vector<1x1x32xf32> to vector<1x32xf32>
    %cst_11 = arith.constant dense<0.000000e+00> : vector<16xf32>
    %16 = vector.multi_reduction <add>, %5, %cst_11 [1] : vector<16x32xf32> to vector<16xf32>
    %17 = vector.shape_cast %16 : vector<16xf32> to vector<16x1xf32>
    %cst_12 = arith.constant 3.200000e+01 : f32
    %18 = vector.broadcast %cst_12 : f32 to vector<16x1xf32>
    %19 = arith.divf %17, %18 : vector<16x1xf32>
    %20 = vector.broadcast %19 : vector<16x1xf32> to vector<16x32xf32>
    %21 = arith.subf %5, %20 : vector<16x32xf32>
    %22 = arith.mulf %21, %21 : vector<16x32xf32>
    %cst_13 = arith.constant dense<0.000000e+00> : vector<16xf32>
    %23 = vector.multi_reduction <add>, %22, %cst_13 [1] : vector<16x32xf32> to vector<16xf32>
    %24 = vector.shape_cast %23 : vector<16xf32> to vector<16x1xf32>
    %cst_14 = arith.constant 3.200000e+01 : f32
    %25 = vector.broadcast %cst_14 : f32 to vector<16x1xf32>
    %26 = arith.divf %24, %25 : vector<16x1xf32>
    %27 = vector.broadcast %19 : vector<16x1xf32> to vector<16x32xf32>
    %28 = arith.subf %5, %27 : vector<16x32xf32>
    %cst_15 = arith.constant 9.99999974E-6 : f32
    %29 = vector.broadcast %cst_15 : f32 to vector<16x1xf32>
    %30 = arith.addf %26, %29 : vector<16x1xf32>
    %31 = math.rsqrt %30 : vector<16x1xf32>
    %32 = vector.broadcast %31 : vector<16x1xf32> to vector<16x32xf32>
    %33 = arith.mulf %28, %32 : vector<16x32xf32>
    %34 = vector.broadcast %13 : vector<1x32xf32> to vector<16x32xf32>
    %35 = arith.mulf %33, %34 : vector<16x32xf32>
    %36 = vector.broadcast %15 : vector<1x32xf32> to vector<16x32xf32>
    %37 = arith.addf %35, %36 : vector<16x32xf32>
    %c0_16 = arith.constant 0 : index
    %c0_17 = arith.constant 0 : index
    %c0_18 = arith.constant 0 : index
    %38 = vector.load %arg5[%c0_16, %c0_17, %c0_18] : memref<2x32x96xf32, #tpu.memory_space<vmem>>, vector<1x32x96xf32>
    %39 = vector.shape_cast %38 : vector<1x32x96xf32> to vector<32x96xf32>
    %cst_19 = arith.constant dense<0.000000e+00> : vector<16x96xf32>
    %40 = tpu.matmul %37, %39, %cst_19 {dimension_numbers = #tpu.dot_dimension_numbers<[1], [0], [0], [1], [0, 0, 1, 1], [], []>} : vector<16x32xf32>, vector<32x96xf32>, vector<16x96xf32> -> vector<16x96xf32>
    %c0_20 = arith.constant 0 : index
    %c0_21 = arith.constant 0 : index
    %c0_22 = arith.constant 0 : index
    %41 = vector.load %arg6[%c0_20, %c0_21, %c0_22] : memref<2x1x96xf32, #tpu.memory_space<vmem>>, vector<1x1x96xf32>
    %42 = vector.shape_cast %41 : vector<1x1x96xf32> to vector<1x96xf32>
    %43 = vector.broadcast %42 : vector<1x96xf32> to vector<16x96xf32>
    %44 = arith.addf %40, %43 : vector<16x96xf32>
    %45 = vector.extract_strided_slice %44 {offsets = [0, 0], sizes = [16, 32], strides = [1, 1]} : vector<16x96xf32> to vector<16x32xf32>
    %46 = vector.shape_cast %45 : vector<16x32xf32> to vector<2x8x32xf32>
    %47 = vector.extract_strided_slice %44 {offsets = [0, 32], sizes = [16, 32], strides = [1, 1]} : vector<16x96xf32> to vector<16x32xf32>
    %48 = vector.shape_cast %47 : vector<16x32xf32> to vector<2x8x32xf32>
    %49 = vector.extract_strided_slice %44 {offsets = [0, 64], sizes = [16, 32], strides = [1, 1]} : vector<16x96xf32> to vector<16x32xf32>
    %50 = vector.shape_cast %49 : vector<16x32xf32> to vector<2x8x32xf32>
    %51 = vector.extract_strided_slice %46 {offsets = [0, 0, 0], sizes = [2, 8, 8], strides = [1, 1, 1]} : vector<2x8x32xf32> to vector<2x8x8xf32>
    %52 = vector.extract_strided_slice %48 {offsets = [0, 0, 0], sizes = [2, 8, 8], strides = [1, 1, 1]} : vector<2x8x32xf32> to vector<2x8x8xf32>
    %53 = vector.extract_strided_slice %50 {offsets = [0, 0, 0], sizes = [2, 8, 8], strides = [1, 1, 1]} : vector<2x8x32xf32> to vector<2x8x8xf32>
    "tpu.trace_start"() <{level = 10 : i32, message = "bqd,bkd->bqk"}> : () -> ()
    %cst_23 = arith.constant dense<0.000000e+00> : vector<2x8x8xf32>
    %54 = tpu.matmul %51, %52, %cst_23 {dimension_numbers = #tpu.dot_dimension_numbers<[2], [2], [1], [1], [0, 0, 0, 1, 1, 1], [0], [0]>} : vector<2x8x8xf32>, vector<2x8x8xf32>, vector<2x8x8xf32> -> vector<2x8x8xf32>
    "tpu.trace_stop"() : () -> ()
    %55 = vector.shape_cast %11 : vector<8x8xf32> to vector<1x8x8xf32>
    %56 = vector.broadcast %55 : vector<1x8x8xf32> to vector<2x8x8xf32>
    %57 = arith.addf %54, %56 : vector<2x8x8xf32>
    %cst_24 = arith.constant dense<0xFF800000> : vector<2x8xf32>
    %58 = vector.multi_reduction <maximumf>, %57, %cst_24 [2] : vector<2x8x8xf32> to vector<2x8xf32>
    %59 = vector.shape_cast %58 : vector<2x8xf32> to vector<2x8x1xf32>
    %60 = vector.broadcast %59 : vector<2x8x1xf32> to vector<2x8x8xf32>
    %61 = arith.subf %57, %60 : vector<2x8x8xf32>
    %62 = math.exp %61 : vector<2x8x8xf32>
    %cst_25 = arith.constant dense<0.000000e+00> : vector<2x8xf32>
    %63 = vector.multi_reduction <add>, %62, %cst_25 [2] : vector<2x8x8xf32> to vector<2x8xf32>
    %64 = vector.shape_cast %63 : vector<2x8xf32> to vector<2x8x1xf32>
    %65 = tpu.reciprocal %64 {approx = true} : vector<2x8x1xf32> -> vector<2x8x1xf32>
    %66 = vector.broadcast %65 : vector<2x8x1xf32> to vector<2x8x8xf32>
    %67 = arith.mulf %62, %66 : vector<2x8x8xf32>
    "tpu.trace_start"() <{level = 10 : i32, message = "bqk,bkd->bqd"}> : () -> ()
    %cst_26 = arith.constant dense<0.000000e+00> : vector<2x8x8xf32>
    %68 = tpu.matmul %67, %53, %cst_26 {dimension_numbers = #tpu.dot_dimension_numbers<[2], [1], [1], [2], [0, 0, 0, 1, 1, 2], [0], [0]>} : vector<2x8x8xf32>, vector<2x8x8xf32>, vector<2x8x8xf32> -> vector<2x8x8xf32>
    "tpu.trace_stop"() : () -> ()
    %69 = vector.extract_strided_slice %46 {offsets = [0, 0, 8], sizes = [2, 8, 8], strides = [1, 1, 1]} : vector<2x8x32xf32> to vector<2x8x8xf32>
    %70 = vector.extract_strided_slice %48 {offsets = [0, 0, 8], sizes = [2, 8, 8], strides = [1, 1, 1]} : vector<2x8x32xf32> to vector<2x8x8xf32>
    %71 = vector.extract_strided_slice %50 {offsets = [0, 0, 8], sizes = [2, 8, 8], strides = [1, 1, 1]} : vector<2x8x32xf32> to vector<2x8x8xf32>
    "tpu.trace_start"() <{level = 10 : i32, message = "bqd,bkd->bqk"}> : () -> ()
    %cst_27 = arith.constant dense<0.000000e+00> : vector<2x8x8xf32>
    %72 = tpu.matmul %69, %70, %cst_27 {dimension_numbers = #tpu.dot_dimension_numbers<[2], [2], [1], [1], [0, 0, 0, 1, 1, 1], [0], [0]>} : vector<2x8x8xf32>, vector<2x8x8xf32>, vector<2x8x8xf32> -> vector<2x8x8xf32>
    "tpu.trace_stop"() : () -> ()
    %73 = vector.shape_cast %11 : vector<8x8xf32> to vector<1x8x8xf32>
    %74 = vector.broadcast %73 : vector<1x8x8xf32> to vector<2x8x8xf32>
    %75 = arith.addf %72, %74 : vector<2x8x8xf32>
    %cst_28 = arith.constant dense<0xFF800000> : vector<2x8xf32>
    %76 = vector.multi_reduction <maximumf>, %75, %cst_28 [2] : vector<2x8x8xf32> to vector<2x8xf32>
    %77 = vector.shape_cast %76 : vector<2x8xf32> to vector<2x8x1xf32>
    %78 = vector.broadcast %77 : vector<2x8x1xf32> to vector<2x8x8xf32>
    %79 = arith.subf %75, %78 : vector<2x8x8xf32>
    %80 = math.exp %79 : vector<2x8x8xf32>
    %cst_29 = arith.constant dense<0.000000e+00> : vector<2x8xf32>
    %81 = vector.multi_reduction <add>, %80, %cst_29 [2] : vector<2x8x8xf32> to vector<2x8xf32>
    %82 = vector.shape_cast %81 : vector<2x8xf32> to vector<2x8x1xf32>
    %83 = tpu.reciprocal %82 {approx = true} : vector<2x8x1xf32> -> vector<2x8x1xf32>
    %84 = vector.broadcast %83 : vector<2x8x1xf32> to vector<2x8x8xf32>
    %85 = arith.mulf %80, %84 : vector<2x8x8xf32>
    "tpu.trace_start"() <{level = 10 : i32, message = "bqk,bkd->bqd"}> : () -> ()
    %cst_30 = arith.constant dense<0.000000e+00> : vector<2x8x8xf32>
    %86 = tpu.matmul %85, %71, %cst_30 {dimension_numbers = #tpu.dot_dimension_numbers<[2], [1], [1], [2], [0, 0, 0, 1, 1, 2], [0], [0]>} : vector<2x8x8xf32>, vector<2x8x8xf32>, vector<2x8x8xf32> -> vector<2x8x8xf32>
    "tpu.trace_stop"() : () -> ()
    %87 = vector.extract_strided_slice %46 {offsets = [0, 0, 16], sizes = [2, 8, 8], strides = [1, 1, 1]} : vector<2x8x32xf32> to vector<2x8x8xf32>
    %88 = vector.extract_strided_slice %48 {offsets = [0, 0, 16], sizes = [2, 8, 8], strides = [1, 1, 1]} : vector<2x8x32xf32> to vector<2x8x8xf32>
    %89 = vector.extract_strided_slice %50 {offsets = [0, 0, 16], sizes = [2, 8, 8], strides = [1, 1, 1]} : vector<2x8x32xf32> to vector<2x8x8xf32>
    "tpu.trace_start"() <{level = 10 : i32, message = "bqd,bkd->bqk"}> : () -> ()
    %cst_31 = arith.constant dense<0.000000e+00> : vector<2x8x8xf32>
    %90 = tpu.matmul %87, %88, %cst_31 {dimension_numbers = #tpu.dot_dimension_numbers<[2], [2], [1], [1], [0, 0, 0, 1, 1, 1], [0], [0]>} : vector<2x8x8xf32>, vector<2x8x8xf32>, vector<2x8x8xf32> -> vector<2x8x8xf32>
    "tpu.trace_stop"() : () -> ()
    %91 = vector.shape_cast %11 : vector<8x8xf32> to vector<1x8x8xf32>
    %92 = vector.broadcast %91 : vector<1x8x8xf32> to vector<2x8x8xf32>
    %93 = arith.addf %90, %92 : vector<2x8x8xf32>
    %cst_32 = arith.constant dense<0xFF800000> : vector<2x8xf32>
    %94 = vector.multi_reduction <maximumf>, %93, %cst_32 [2] : vector<2x8x8xf32> to vector<2x8xf32>
    %95 = vector.shape_cast %94 : vector<2x8xf32> to vector<2x8x1xf32>
    %96 = vector.broadcast %95 : vector<2x8x1xf32> to vector<2x8x8xf32>
    %97 = arith.subf %93, %96 : vector<2x8x8xf32>
    %98 = math.exp %97 : vector<2x8x8xf32>
    %cst_33 = arith.constant dense<0.000000e+00> : vector<2x8xf32>
    %99 = vector.multi_reduction <add>, %98, %cst_33 [2] : vector<2x8x8xf32> to vector<2x8xf32>
    %100 = vector.shape_cast %99 : vector<2x8xf32> to vector<2x8x1xf32>
    %101 = tpu.reciprocal %100 {approx = true} : vector<2x8x1xf32> -> vector<2x8x1xf32>
    %102 = vector.broadcast %101 : vector<2x8x1xf32> to vector<2x8x8xf32>
    %103 = arith.mulf %98, %102 : vector<2x8x8xf32>
    "tpu.trace_start"() <{level = 10 : i32, message = "bqk,bkd->bqd"}> : () -> ()
    %cst_34 = arith.constant dense<0.000000e+00> : vector<2x8x8xf32>
    %104 = tpu.matmul %103, %89, %cst_34 {dimension_numbers = #tpu.dot_dimension_numbers<[2], [1], [1], [2], [0, 0, 0, 1, 1, 2], [0], [0]>} : vector<2x8x8xf32>, vector<2x8x8xf32>, vector<2x8x8xf32> -> vector<2x8x8xf32>
    "tpu.trace_stop"() : () -> ()
    %105 = vector.extract_strided_slice %46 {offsets = [0, 0, 24], sizes = [2, 8, 8], strides = [1, 1, 1]} : vector<2x8x32xf32> to vector<2x8x8xf32>
    %106 = vector.extract_strided_slice %48 {offsets = [0, 0, 24], sizes = [2, 8, 8], strides = [1, 1, 1]} : vector<2x8x32xf32> to vector<2x8x8xf32>
    %107 = vector.extract_strided_slice %50 {offsets = [0, 0, 24], sizes = [2, 8, 8], strides = [1, 1, 1]} : vector<2x8x32xf32> to vector<2x8x8xf32>
    "tpu.trace_start"() <{level = 10 : i32, message = "bqd,bkd->bqk"}> : () -> ()
    %cst_35 = arith.constant dense<0.000000e+00> : vector<2x8x8xf32>
    %108 = tpu.matmul %105, %106, %cst_35 {dimension_numbers = #tpu.dot_dimension_numbers<[2], [2], [1], [1], [0, 0, 0, 1, 1, 1], [0], [0]>} : vector<2x8x8xf32>, vector<2x8x8xf32>, vector<2x8x8xf32> -> vector<2x8x8xf32>
    "tpu.trace_stop"() : () -> ()
    %109 = vector.shape_cast %11 : vector<8x8xf32> to vector<1x8x8xf32>
    %110 = vector.broadcast %109 : vector<1x8x8xf32> to vector<2x8x8xf32>
    %111 = arith.addf %108, %110 : vector<2x8x8xf32>
    %cst_36 = arith.constant dense<0xFF800000> : vector<2x8xf32>
    %112 = vector.multi_reduction <maximumf>, %111, %cst_36 [2] : vector<2x8x8xf32> to vector<2x8xf32>
    %113 = vector.shape_cast %112 : vector<2x8xf32> to vector<2x8x1xf32>
    %114 = vector.broadcast %113 : vector<2x8x1xf32> to vector<2x8x8xf32>
    %115 = arith.subf %111, %114 : vector<2x8x8xf32>
    %116 = math.exp %115 : vector<2x8x8xf32>
    %cst_37 = arith.constant dense<0.000000e+00> : vector<2x8xf32>
    %117 = vector.multi_reduction <add>, %116, %cst_37 [2] : vector<2x8x8xf32> to vector<2x8xf32>
    %118 = vector.shape_cast %117 : vector<2x8xf32> to vector<2x8x1xf32>
    %119 = tpu.reciprocal %118 {approx = true} : vector<2x8x1xf32> -> vector<2x8x1xf32>
    %120 = vector.broadcast %119 : vector<2x8x1xf32> to vector<2x8x8xf32>
    %121 = arith.mulf %116, %120 : vector<2x8x8xf32>
    "tpu.trace_start"() <{level = 10 : i32, message = "bqk,bkd->bqd"}> : () -> ()
    %cst_38 = arith.constant dense<0.000000e+00> : vector<2x8x8xf32>
    %122 = tpu.matmul %121, %107, %cst_38 {dimension_numbers = #tpu.dot_dimension_numbers<[2], [1], [1], [2], [0, 0, 0, 1, 1, 2], [0], [0]>} : vector<2x8x8xf32>, vector<2x8x8xf32>, vector<2x8x8xf32> -> vector<2x8x8xf32>
    "tpu.trace_stop"() : () -> ()
    %123 = tpu.concatenate %68, %86, %104, %122 in 2 : vector<2x8x8xf32>, vector<2x8x8xf32>, vector<2x8x8xf32>, vector<2x8x8xf32> -> vector<2x8x32xf32>
    %124 = vector.shape_cast %123 : vector<2x8x32xf32> to vector<16x32xf32>
    %c0_39 = arith.constant 0 : index
    %c0_40 = arith.constant 0 : index
    %c0_41 = arith.constant 0 : index
    %125 = vector.load %arg7[%c0_39, %c0_40, %c0_41] : memref<2x32x32xf32, #tpu.memory_space<vmem>>, vector<1x32x32xf32>
    %126 = vector.shape_cast %125 : vector<1x32x32xf32> to vector<32x32xf32>
    %cst_42 = arith.constant dense<0.000000e+00> : vector<16x32xf32>
    %127 = tpu.matmul %124, %126, %cst_42 {dimension_numbers = #tpu.dot_dimension_numbers<[1], [0], [0], [1], [0, 0, 1, 1], [], []>} : vector<16x32xf32>, vector<32x32xf32>, vector<16x32xf32> -> vector<16x32xf32>
    %c0_43 = arith.constant 0 : index
    %c0_44 = arith.constant 0 : index
    %c0_45 = arith.constant 0 : index
    %128 = vector.load %arg8[%c0_43, %c0_44, %c0_45] : memref<2x1x32xf32, #tpu.memory_space<vmem>>, vector<1x1x32xf32>
    %129 = vector.shape_cast %128 : vector<1x1x32xf32> to vector<1x32xf32>
    %130 = vector.broadcast %129 : vector<1x32xf32> to vector<16x32xf32>
    %131 = arith.addf %127, %130 : vector<16x32xf32>
    %132 = arith.addf %5, %131 : vector<16x32xf32>
    %c0_46 = arith.constant 0 : index
    %c0_47 = arith.constant 0 : index
    %c0_48 = arith.constant 0 : index
    %133 = vector.load %arg9[%c0_46, %c0_47, %c0_48] : memref<2x1x32xf32, #tpu.memory_space<vmem>>, vector<1x1x32xf32>
    %134 = vector.shape_cast %133 : vector<1x1x32xf32> to vector<1x32xf32>
    %c0_49 = arith.constant 0 : index
    %c0_50 = arith.constant 0 : index
    %c0_51 = arith.constant 0 : index
    %135 = vector.load %arg10[%c0_49, %c0_50, %c0_51] : memref<2x1x32xf32, #tpu.memory_space<vmem>>, vector<1x1x32xf32>
    %136 = vector.shape_cast %135 : vector<1x1x32xf32> to vector<1x32xf32>
    %cst_52 = arith.constant dense<0.000000e+00> : vector<16xf32>
    %137 = vector.multi_reduction <add>, %132, %cst_52 [1] : vector<16x32xf32> to vector<16xf32>
    %138 = vector.shape_cast %137 : vector<16xf32> to vector<16x1xf32>
    %cst_53 = arith.constant 3.200000e+01 : f32
    %139 = vector.broadcast %cst_53 : f32 to vector<16x1xf32>
    %140 = arith.divf %138, %139 : vector<16x1xf32>
    %141 = vector.broadcast %140 : vector<16x1xf32> to vector<16x32xf32>
    %142 = arith.subf %132, %141 : vector<16x32xf32>
    %143 = arith.mulf %142, %142 : vector<16x32xf32>
    %cst_54 = arith.constant dense<0.000000e+00> : vector<16xf32>
    %144 = vector.multi_reduction <add>, %143, %cst_54 [1] : vector<16x32xf32> to vector<16xf32>
    %145 = vector.shape_cast %144 : vector<16xf32> to vector<16x1xf32>
    %cst_55 = arith.constant 3.200000e+01 : f32
    %146 = vector.broadcast %cst_55 : f32 to vector<16x1xf32>
    %147 = arith.divf %145, %146 : vector<16x1xf32>
    %148 = vector.broadcast %140 : vector<16x1xf32> to vector<16x32xf32>
    %149 = arith.subf %132, %148 : vector<16x32xf32>
    %cst_56 = arith.constant 9.99999974E-6 : f32
    %150 = vector.broadcast %cst_56 : f32 to vector<16x1xf32>
    %151 = arith.addf %147, %150 : vector<16x1xf32>
    %152 = math.rsqrt %151 : vector<16x1xf32>
    %153 = vector.broadcast %152 : vector<16x1xf32> to vector<16x32xf32>
    %154 = arith.mulf %149, %153 : vector<16x32xf32>
    %155 = vector.broadcast %134 : vector<1x32xf32> to vector<16x32xf32>
    %156 = arith.mulf %154, %155 : vector<16x32xf32>
    %157 = vector.broadcast %136 : vector<1x32xf32> to vector<16x32xf32>
    %158 = arith.addf %156, %157 : vector<16x32xf32>
    %c0_57 = arith.constant 0 : index
    %c0_58 = arith.constant 0 : index
    %c0_59 = arith.constant 0 : index
    %159 = vector.load %arg11[%c0_57, %c0_58, %c0_59] : memref<2x32x128xf32, #tpu.memory_space<vmem>>, vector<1x32x128xf32>
    %160 = vector.shape_cast %159 : vector<1x32x128xf32> to vector<32x128xf32>
    %cst_60 = arith.constant dense<0.000000e+00> : vector<16x128xf32>
    %161 = tpu.matmul %158, %160, %cst_60 {dimension_numbers = #tpu.dot_dimension_numbers<[1], [0], [0], [1], [0, 0, 1, 1], [], []>} : vector<16x32xf32>, vector<32x128xf32>, vector<16x128xf32> -> vector<16x128xf32>
    %c0_61 = arith.constant 0 : index
    %c0_62 = arith.constant 0 : index
    %c0_63 = arith.constant 0 : index
    %162 = vector.load %arg12[%c0_61, %c0_62, %c0_63] : memref<2x1x128xf32, #tpu.memory_space<vmem>>, vector<1x1x128xf32>
    %163 = vector.shape_cast %162 : vector<1x1x128xf32> to vector<1x128xf32>
    %164 = vector.broadcast %163 : vector<1x128xf32> to vector<16x128xf32>
    %165 = arith.addf %161, %164 : vector<16x128xf32>
    %cst_64 = arith.constant 5.000000e-01 : f32
    %166 = vector.broadcast %cst_64 : f32 to vector<16x128xf32>
    %167 = arith.mulf %166, %165 : vector<16x128xf32>
    %cst_65 = arith.constant 4.471500e-02 : f32
    %168 = vector.broadcast %cst_65 : f32 to vector<16x128xf32>
    %169 = arith.mulf %168, %165 : vector<16x128xf32>
    %170 = arith.mulf %169, %165 : vector<16x128xf32>
    %171 = arith.mulf %170, %165 : vector<16x128xf32>
    %172 = arith.addf %165, %171 : vector<16x128xf32>
    %cst_66 = arith.constant 0.797884583 : f32
    %173 = vector.broadcast %cst_66 : f32 to vector<16x128xf32>
    %174 = arith.mulf %173, %172 : vector<16x128xf32>
    %175 = math.tanh %174 : vector<16x128xf32>
    %cst_67 = arith.constant 1.000000e+00 : f32
    %176 = vector.broadcast %cst_67 : f32 to vector<16x128xf32>
    %177 = arith.addf %176, %175 : vector<16x128xf32>
    %178 = arith.mulf %167, %177 : vector<16x128xf32>
    %c0_68 = arith.constant 0 : index
    %c0_69 = arith.constant 0 : index
    %c0_70 = arith.constant 0 : index
    %179 = vector.load %arg13[%c0_68, %c0_69, %c0_70] : memref<2x128x32xf32, #tpu.memory_space<vmem>>, vector<1x128x32xf32>
    %180 = vector.shape_cast %179 : vector<1x128x32xf32> to vector<128x32xf32>
    %cst_71 = arith.constant dense<0.000000e+00> : vector<16x32xf32>
    %181 = tpu.matmul %178, %180, %cst_71 {dimension_numbers = #tpu.dot_dimension_numbers<[1], [0], [0], [1], [0, 0, 1, 1], [], []>} : vector<16x128xf32>, vector<128x32xf32>, vector<16x32xf32> -> vector<16x32xf32>
    %c0_72 = arith.constant 0 : index
    %c0_73 = arith.constant 0 : index
    %c0_74 = arith.constant 0 : index
    %182 = vector.load %arg14[%c0_72, %c0_73, %c0_74] : memref<2x1x32xf32, #tpu.memory_space<vmem>>, vector<1x1x32xf32>
    %183 = vector.shape_cast %182 : vector<1x1x32xf32> to vector<1x32xf32>
    %184 = vector.broadcast %183 : vector<1x32xf32> to vector<16x32xf32>
    %185 = arith.addf %181, %184 : vector<16x32xf32>
    %186 = arith.addf %132, %185 : vector<16x32xf32>
    %c1 = arith.constant 1 : index
    %c0_75 = arith.constant 0 : index
    %c0_76 = arith.constant 0 : index
    %187 = vector.load %arg3[%c1, %c0_75, %c0_76] : memref<2x1x32xf32, #tpu.memory_space<vmem>>, vector<1x1x32xf32>
    %188 = vector.shape_cast %187 : vector<1x1x32xf32> to vector<1x32xf32>
    %c1_77 = arith.constant 1 : index
    %c0_78 = arith.constant 0 : index
    %c0_79 = arith.constant 0 : index
    %189 = vector.load %arg4[%c1_77, %c0_78, %c0_79] : memref<2x1x32xf32, #tpu.memory_space<vmem>>, vector<1x1x32xf32>
    %190 = vector.shape_cast %189 : vector<1x1x32xf32> to vector<1x32xf32>
    %cst_80 = arith.constant dense<0.000000e+00> : vector<16xf32>
    %191 = vector.multi_reduction <add>, %186, %cst_80 [1] : vector<16x32xf32> to vector<16xf32>
    %192 = vector.shape_cast %191 : vector<16xf32> to vector<16x1xf32>
    %cst_81 = arith.constant 3.200000e+01 : f32
    %193 = vector.broadcast %cst_81 : f32 to vector<16x1xf32>
    %194 = arith.divf %192, %193 : vector<16x1xf32>
    %195 = vector.broadcast %194 : vector<16x1xf32> to vector<16x32xf32>
    %196 = arith.subf %186, %195 : vector<16x32xf32>
    %197 = arith.mulf %196, %196 : vector<16x32xf32>
    %cst_82 = arith.constant dense<0.000000e+00> : vector<16xf32>
    %198 = vector.multi_reduction <add>, %197, %cst_82 [1] : vector<16x32xf32> to vector<16xf32>
    %199 = vector.shape_cast %198 : vector<16xf32> to vector<16x1xf32>
    %cst_83 = arith.constant 3.200000e+01 : f32
    %200 = vector.broadcast %cst_83 : f32 to vector<16x1xf32>
    %201 = arith.divf %199, %200 : vector<16x1xf32>
    %202 = vector.broadcast %194 : vector<16x1xf32> to vector<16x32xf32>
    %203 = arith.subf %186, %202 : vector<16x32xf32>
    %cst_84 = arith.constant 9.99999974E-6 : f32
    %204 = vector.broadcast %cst_84 : f32 to vector<16x1xf32>
    %205 = arith.addf %201, %204 : vector<16x1xf32>
    %206 = math.rsqrt %205 : vector<16x1xf32>
    %207 = vector.broadcast %206 : vector<16x1xf32> to vector<16x32xf32>
    %208 = arith.mulf %203, %207 : vector<16x32xf32>
    %209 = vector.broadcast %188 : vector<1x32xf32> to vector<16x32xf32>
    %210 = arith.mulf %208, %209 : vector<16x32xf32>
    %211 = vector.broadcast %190 : vector<1x32xf32> to vector<16x32xf32>
    %212 = arith.addf %210, %211 : vector<16x32xf32>
    %c1_85 = arith.constant 1 : index
    %c0_86 = arith.constant 0 : index
    %c0_87 = arith.constant 0 : index
    %213 = vector.load %arg5[%c1_85, %c0_86, %c0_87] : memref<2x32x96xf32, #tpu.memory_space<vmem>>, vector<1x32x96xf32>
    %214 = vector.shape_cast %213 : vector<1x32x96xf32> to vector<32x96xf32>
    %cst_88 = arith.constant dense<0.000000e+00> : vector<16x96xf32>
    %215 = tpu.matmul %212, %214, %cst_88 {dimension_numbers = #tpu.dot_dimension_numbers<[1], [0], [0], [1], [0, 0, 1, 1], [], []>} : vector<16x32xf32>, vector<32x96xf32>, vector<16x96xf32> -> vector<16x96xf32>
    %c1_89 = arith.constant 1 : index
    %c0_90 = arith.constant 0 : index
    %c0_91 = arith.constant 0 : index
    %216 = vector.load %arg6[%c1_89, %c0_90, %c0_91] : memref<2x1x96xf32, #tpu.memory_space<vmem>>, vector<1x1x96xf32>
    %217 = vector.shape_cast %216 : vector<1x1x96xf32> to vector<1x96xf32>
    %218 = vector.broadcast %217 : vector<1x96xf32> to vector<16x96xf32>
    %219 = arith.addf %215, %218 : vector<16x96xf32>
    %220 = vector.extract_strided_slice %219 {offsets = [0, 0], sizes = [16, 32], strides = [1, 1]} : vector<16x96xf32> to vector<16x32xf32>
    %221 = vector.shape_cast %220 : vector<16x32xf32> to vector<2x8x32xf32>
    %222 = vector.extract_strided_slice %219 {offsets = [0, 32], sizes = [16, 32], strides = [1, 1]} : vector<16x96xf32> to vector<16x32xf32>
    %223 = vector.shape_cast %222 : vector<16x32xf32> to vector<2x8x32xf32>
    %224 = vector.extract_strided_slice %219 {offsets = [0, 64], sizes = [16, 32], strides = [1, 1]} : vector<16x96xf32> to vector<16x32xf32>
    %225 = vector.shape_cast %224 : vector<16x32xf32> to vector<2x8x32xf32>
    %226 = vector.extract_strided_slice %221 {offsets = [0, 0, 0], sizes = [2, 8, 8], strides = [1, 1, 1]} : vector<2x8x32xf32> to vector<2x8x8xf32>
    %227 = vector.extract_strided_slice %223 {offsets = [0, 0, 0], sizes = [2, 8, 8], strides = [1, 1, 1]} : vector<2x8x32xf32> to vector<2x8x8xf32>
    %228 = vector.extract_strided_slice %225 {offsets = [0, 0, 0], sizes = [2, 8, 8], strides = [1, 1, 1]} : vector<2x8x32xf32> to vector<2x8x8xf32>
    "tpu.trace_start"() <{level = 10 : i32, message = "bqd,bkd->bqk"}> : () -> ()
    %cst_92 = arith.constant dense<0.000000e+00> : vector<2x8x8xf32>
    %229 = tpu.matmul %226, %227, %cst_92 {dimension_numbers = #tpu.dot_dimension_numbers<[2], [2], [1], [1], [0, 0, 0, 1, 1, 1], [0], [0]>} : vector<2x8x8xf32>, vector<2x8x8xf32>, vector<2x8x8xf32> -> vector<2x8x8xf32>
    "tpu.trace_stop"() : () -> ()
    %230 = vector.shape_cast %11 : vector<8x8xf32> to vector<1x8x8xf32>
    %231 = vector.broadcast %230 : vector<1x8x8xf32> to vector<2x8x8xf32>
    %232 = arith.addf %229, %231 : vector<2x8x8xf32>
    %cst_93 = arith.constant dense<0xFF800000> : vector<2x8xf32>
    %233 = vector.multi_reduction <maximumf>, %232, %cst_93 [2] : vector<2x8x8xf32> to vector<2x8xf32>
    %234 = vector.shape_cast %233 : vector<2x8xf32> to vector<2x8x1xf32>
    %235 = vector.broadcast %234 : vector<2x8x1xf32> to vector<2x8x8xf32>
    %236 = arith.subf %232, %235 : vector<2x8x8xf32>
    %237 = math.exp %236 : vector<2x8x8xf32>
    %cst_94 = arith.constant dense<0.000000e+00> : vector<2x8xf32>
    %238 = vector.multi_reduction <add>, %237, %cst_94 [2] : vector<2x8x8xf32> to vector<2x8xf32>
    %239 = vector.shape_cast %238 : vector<2x8xf32> to vector<2x8x1xf32>
    %240 = tpu.reciprocal %239 {approx = true} : vector<2x8x1xf32> -> vector<2x8x1xf32>
    %241 = vector.broadcast %240 : vector<2x8x1xf32> to vector<2x8x8xf32>
    %242 = arith.mulf %237, %241 : vector<2x8x8xf32>
    "tpu.trace_start"() <{level = 10 : i32, message = "bqk,bkd->bqd"}> : () -> ()
    %cst_95 = arith.constant dense<0.000000e+00> : vector<2x8x8xf32>
    %243 = tpu.matmul %242, %228, %cst_95 {dimension_numbers = #tpu.dot_dimension_numbers<[2], [1], [1], [2], [0, 0, 0, 1, 1, 2], [0], [0]>} : vector<2x8x8xf32>, vector<2x8x8xf32>, vector<2x8x8xf32> -> vector<2x8x8xf32>
    "tpu.trace_stop"() : () -> ()
    %244 = vector.extract_strided_slice %221 {offsets = [0, 0, 8], sizes = [2, 8, 8], strides = [1, 1, 1]} : vector<2x8x32xf32> to vector<2x8x8xf32>
    %245 = vector.extract_strided_slice %223 {offsets = [0, 0, 8], sizes = [2, 8, 8], strides = [1, 1, 1]} : vector<2x8x32xf32> to vector<2x8x8xf32>
    %246 = vector.extract_strided_slice %225 {offsets = [0, 0, 8], sizes = [2, 8, 8], strides = [1, 1, 1]} : vector<2x8x32xf32> to vector<2x8x8xf32>
    "tpu.trace_start"() <{level = 10 : i32, message = "bqd,bkd->bqk"}> : () -> ()
    %cst_96 = arith.constant dense<0.000000e+00> : vector<2x8x8xf32>
    %247 = tpu.matmul %244, %245, %cst_96 {dimension_numbers = #tpu.dot_dimension_numbers<[2], [2], [1], [1], [0, 0, 0, 1, 1, 1], [0], [0]>} : vector<2x8x8xf32>, vector<2x8x8xf32>, vector<2x8x8xf32> -> vector<2x8x8xf32>
    "tpu.trace_stop"() : () -> ()
    %248 = vector.shape_cast %11 : vector<8x8xf32> to vector<1x8x8xf32>
    %249 = vector.broadcast %248 : vector<1x8x8xf32> to vector<2x8x8xf32>
    %250 = arith.addf %247, %249 : vector<2x8x8xf32>
    %cst_97 = arith.constant dense<0xFF800000> : vector<2x8xf32>
    %251 = vector.multi_reduction <maximumf>, %250, %cst_97 [2] : vector<2x8x8xf32> to vector<2x8xf32>
    %252 = vector.shape_cast %251 : vector<2x8xf32> to vector<2x8x1xf32>
    %253 = vector.broadcast %252 : vector<2x8x1xf32> to vector<2x8x8xf32>
    %254 = arith.subf %250, %253 : vector<2x8x8xf32>
    %255 = math.exp %254 : vector<2x8x8xf32>
    %cst_98 = arith.constant dense<0.000000e+00> : vector<2x8xf32>
    %256 = vector.multi_reduction <add>, %255, %cst_98 [2] : vector<2x8x8xf32> to vector<2x8xf32>
    %257 = vector.shape_cast %256 : vector<2x8xf32> to vector<2x8x1xf32>
    %258 = tpu.reciprocal %257 {approx = true} : vector<2x8x1xf32> -> vector<2x8x1xf32>
    %259 = vector.broadcast %258 : vector<2x8x1xf32> to vector<2x8x8xf32>
    %260 = arith.mulf %255, %259 : vector<2x8x8xf32>
    "tpu.trace_start"() <{level = 10 : i32, message = "bqk,bkd->bqd"}> : () -> ()
    %cst_99 = arith.constant dense<0.000000e+00> : vector<2x8x8xf32>
    %261 = tpu.matmul %260, %246, %cst_99 {dimension_numbers = #tpu.dot_dimension_numbers<[2], [1], [1], [2], [0, 0, 0, 1, 1, 2], [0], [0]>} : vector<2x8x8xf32>, vector<2x8x8xf32>, vector<2x8x8xf32> -> vector<2x8x8xf32>
    "tpu.trace_stop"() : () -> ()
    %262 = vector.extract_strided_slice %221 {offsets = [0, 0, 16], sizes = [2, 8, 8], strides = [1, 1, 1]} : vector<2x8x32xf32> to vector<2x8x8xf32>
    %263 = vector.extract_strided_slice %223 {offsets = [0, 0, 16], sizes = [2, 8, 8], strides = [1, 1, 1]} : vector<2x8x32xf32> to vector<2x8x8xf32>
    %264 = vector.extract_strided_slice %225 {offsets = [0, 0, 16], sizes = [2, 8, 8], strides = [1, 1, 1]} : vector<2x8x32xf32> to vector<2x8x8xf32>
    "tpu.trace_start"() <{level = 10 : i32, message = "bqd,bkd->bqk"}> : () -> ()
    %cst_100 = arith.constant dense<0.000000e+00> : vector<2x8x8xf32>
    %265 = tpu.matmul %262, %263, %cst_100 {dimension_numbers = #tpu.dot_dimension_numbers<[2], [2], [1], [1], [0, 0, 0, 1, 1, 1], [0], [0]>} : vector<2x8x8xf32>, vector<2x8x8xf32>, vector<2x8x8xf32> -> vector<2x8x8xf32>
    "tpu.trace_stop"() : () -> ()
    %266 = vector.shape_cast %11 : vector<8x8xf32> to vector<1x8x8xf32>
    %267 = vector.broadcast %266 : vector<1x8x8xf32> to vector<2x8x8xf32>
    %268 = arith.addf %265, %267 : vector<2x8x8xf32>
    %cst_101 = arith.constant dense<0xFF800000> : vector<2x8xf32>
    %269 = vector.multi_reduction <maximumf>, %268, %cst_101 [2] : vector<2x8x8xf32> to vector<2x8xf32>
    %270 = vector.shape_cast %269 : vector<2x8xf32> to vector<2x8x1xf32>
    %271 = vector.broadcast %270 : vector<2x8x1xf32> to vector<2x8x8xf32>
    %272 = arith.subf %268, %271 : vector<2x8x8xf32>
    %273 = math.exp %272 : vector<2x8x8xf32>
    %cst_102 = arith.constant dense<0.000000e+00> : vector<2x8xf32>
    %274 = vector.multi_reduction <add>, %273, %cst_102 [2] : vector<2x8x8xf32> to vector<2x8xf32>
    %275 = vector.shape_cast %274 : vector<2x8xf32> to vector<2x8x1xf32>
    %276 = tpu.reciprocal %275 {approx = true} : vector<2x8x1xf32> -> vector<2x8x1xf32>
    %277 = vector.broadcast %276 : vector<2x8x1xf32> to vector<2x8x8xf32>
    %278 = arith.mulf %273, %277 : vector<2x8x8xf32>
    "tpu.trace_start"() <{level = 10 : i32, message = "bqk,bkd->bqd"}> : () -> ()
    %cst_103 = arith.constant dense<0.000000e+00> : vector<2x8x8xf32>
    %279 = tpu.matmul %278, %264, %cst_103 {dimension_numbers = #tpu.dot_dimension_numbers<[2], [1], [1], [2], [0, 0, 0, 1, 1, 2], [0], [0]>} : vector<2x8x8xf32>, vector<2x8x8xf32>, vector<2x8x8xf32> -> vector<2x8x8xf32>
    "tpu.trace_stop"() : () -> ()
    %280 = vector.extract_strided_slice %221 {offsets = [0, 0, 24], sizes = [2, 8, 8], strides = [1, 1, 1]} : vector<2x8x32xf32> to vector<2x8x8xf32>
    %281 = vector.extract_strided_slice %223 {offsets = [0, 0, 24], sizes = [2, 8, 8], strides = [1, 1, 1]} : vector<2x8x32xf32> to vector<2x8x8xf32>
    %282 = vector.extract_strided_slice %225 {offsets = [0, 0, 24], sizes = [2, 8, 8], strides = [1, 1, 1]} : vector<2x8x32xf32> to vector<2x8x8xf32>
    "tpu.trace_start"() <{level = 10 : i32, message = "bqd,bkd->bqk"}> : () -> ()
    %cst_104 = arith.constant dense<0.000000e+00> : vector<2x8x8xf32>
    %283 = tpu.matmul %280, %281, %cst_104 {dimension_numbers = #tpu.dot_dimension_numbers<[2], [2], [1], [1], [0, 0, 0, 1, 1, 1], [0], [0]>} : vector<2x8x8xf32>, vector<2x8x8xf32>, vector<2x8x8xf32> -> vector<2x8x8xf32>
    "tpu.trace_stop"() : () -> ()
    %284 = vector.shape_cast %11 : vector<8x8xf32> to vector<1x8x8xf32>
    %285 = vector.broadcast %284 : vector<1x8x8xf32> to vector<2x8x8xf32>
    %286 = arith.addf %283, %285 : vector<2x8x8xf32>
    %cst_105 = arith.constant dense<0xFF800000> : vector<2x8xf32>
    %287 = vector.multi_reduction <maximumf>, %286, %cst_105 [2] : vector<2x8x8xf32> to vector<2x8xf32>
    %288 = vector.shape_cast %287 : vector<2x8xf32> to vector<2x8x1xf32>
    %289 = vector.broadcast %288 : vector<2x8x1xf32> to vector<2x8x8xf32>
    %290 = arith.subf %286, %289 : vector<2x8x8xf32>
    %291 = math.exp %290 : vector<2x8x8xf32>
    %cst_106 = arith.constant dense<0.000000e+00> : vector<2x8xf32>
    %292 = vector.multi_reduction <add>, %291, %cst_106 [2] : vector<2x8x8xf32> to vector<2x8xf32>
    %293 = vector.shape_cast %292 : vector<2x8xf32> to vector<2x8x1xf32>
    %294 = tpu.reciprocal %293 {approx = true} : vector<2x8x1xf32> -> vector<2x8x1xf32>
    %295 = vector.broadcast %294 : vector<2x8x1xf32> to vector<2x8x8xf32>
    %296 = arith.mulf %291, %295 : vector<2x8x8xf32>
    "tpu.trace_start"() <{level = 10 : i32, message = "bqk,bkd->bqd"}> : () -> ()
    %cst_107 = arith.constant dense<0.000000e+00> : vector<2x8x8xf32>
    %297 = tpu.matmul %296, %282, %cst_107 {dimension_numbers = #tpu.dot_dimension_numbers<[2], [1], [1], [2], [0, 0, 0, 1, 1, 2], [0], [0]>} : vector<2x8x8xf32>, vector<2x8x8xf32>, vector<2x8x8xf32> -> vector<2x8x8xf32>
    "tpu.trace_stop"() : () -> ()
    %298 = tpu.concatenate %243, %261, %279, %297 in 2 : vector<2x8x8xf32>, vector<2x8x8xf32>, vector<2x8x8xf32>, vector<2x8x8xf32> -> vector<2x8x32xf32>
    %299 = vector.shape_cast %298 : vector<2x8x32xf32> to vector<16x32xf32>
    %c1_108 = arith.constant 1 : index
    %c0_109 = arith.constant 0 : index
    %c0_110 = arith.constant 0 : index
    %300 = vector.load %arg7[%c1_108, %c0_109, %c0_110] : memref<2x32x32xf32, #tpu.memory_space<vmem>>, vector<1x32x32xf32>
    %301 = vector.shape_cast %300 : vector<1x32x32xf32> to vector<32x32xf32>
    %cst_111 = arith.constant dense<0.000000e+00> : vector<16x32xf32>
    %302 = tpu.matmul %299, %301, %cst_111 {dimension_numbers = #tpu.dot_dimension_numbers<[1], [0], [0], [1], [0, 0, 1, 1], [], []>} : vector<16x32xf32>, vector<32x32xf32>, vector<16x32xf32> -> vector<16x32xf32>
    %c1_112 = arith.constant 1 : index
    %c0_113 = arith.constant 0 : index
    %c0_114 = arith.constant 0 : index
    %303 = vector.load %arg8[%c1_112, %c0_113, %c0_114] : memref<2x1x32xf32, #tpu.memory_space<vmem>>, vector<1x1x32xf32>
    %304 = vector.shape_cast %303 : vector<1x1x32xf32> to vector<1x32xf32>
    %305 = vector.broadcast %304 : vector<1x32xf32> to vector<16x32xf32>
    %306 = arith.addf %302, %305 : vector<16x32xf32>
    %307 = arith.addf %186, %306 : vector<16x32xf32>
    %c1_115 = arith.constant 1 : index
    %c0_116 = arith.constant 0 : index
    %c0_117 = arith.constant 0 : index
    %308 = vector.load %arg9[%c1_115, %c0_116, %c0_117] : memref<2x1x32xf32, #tpu.memory_space<vmem>>, vector<1x1x32xf32>
    %309 = vector.shape_cast %308 : vector<1x1x32xf32> to vector<1x32xf32>
    %c1_118 = arith.constant 1 : index
    %c0_119 = arith.constant 0 : index
    %c0_120 = arith.constant 0 : index
    %310 = vector.load %arg10[%c1_118, %c0_119, %c0_120] : memref<2x1x32xf32, #tpu.memory_space<vmem>>, vector<1x1x32xf32>
    %311 = vector.shape_cast %310 : vector<1x1x32xf32> to vector<1x32xf32>
    %cst_121 = arith.constant dense<0.000000e+00> : vector<16xf32>
    %312 = vector.multi_reduction <add>, %307, %cst_121 [1] : vector<16x32xf32> to vector<16xf32>
    %313 = vector.shape_cast %312 : vector<16xf32> to vector<16x1xf32>
    %cst_122 = arith.constant 3.200000e+01 : f32
    %314 = vector.broadcast %cst_122 : f32 to vector<16x1xf32>
    %315 = arith.divf %313, %314 : vector<16x1xf32>
    %316 = vector.broadcast %315 : vector<16x1xf32> to vector<16x32xf32>
    %317 = arith.subf %307, %316 : vector<16x32xf32>
    %318 = arith.mulf %317, %317 : vector<16x32xf32>
    %cst_123 = arith.constant dense<0.000000e+00> : vector<16xf32>
    %319 = vector.multi_reduction <add>, %318, %cst_123 [1] : vector<16x32xf32> to vector<16xf32>
    %320 = vector.shape_cast %319 : vector<16xf32> to vector<16x1xf32>
    %cst_124 = arith.constant 3.200000e+01 : f32
    %321 = vector.broadcast %cst_124 : f32 to vector<16x1xf32>
    %322 = arith.divf %320, %321 : vector<16x1xf32>
    %323 = vector.broadcast %315 : vector<16x1xf32> to vector<16x32xf32>
    %324 = arith.subf %307, %323 : vector<16x32xf32>
    %cst_125 = arith.constant 9.99999974E-6 : f32
    %325 = vector.broadcast %cst_125 : f32 to vector<16x1xf32>
    %326 = arith.addf %322, %325 : vector<16x1xf32>
    %327 = math.rsqrt %326 : vector<16x1xf32>
    %328 = vector.broadcast %327 : vector<16x1xf32> to vector<16x32xf32>
    %329 = arith.mulf %324, %328 : vector<16x32xf32>
    %330 = vector.broadcast %309 : vector<1x32xf32> to vector<16x32xf32>
    %331 = arith.mulf %329, %330 : vector<16x32xf32>
    %332 = vector.broadcast %311 : vector<1x32xf32> to vector<16x32xf32>
    %333 = arith.addf %331, %332 : vector<16x32xf32>
    %c1_126 = arith.constant 1 : index
    %c0_127 = arith.constant 0 : index
    %c0_128 = arith.constant 0 : index
    %334 = vector.load %arg11[%c1_126, %c0_127, %c0_128] : memref<2x32x128xf32, #tpu.memory_space<vmem>>, vector<1x32x128xf32>
    %335 = vector.shape_cast %334 : vector<1x32x128xf32> to vector<32x128xf32>
    %cst_129 = arith.constant dense<0.000000e+00> : vector<16x128xf32>
    %336 = tpu.matmul %333, %335, %cst_129 {dimension_numbers = #tpu.dot_dimension_numbers<[1], [0], [0], [1], [0, 0, 1, 1], [], []>} : vector<16x32xf32>, vector<32x128xf32>, vector<16x128xf32> -> vector<16x128xf32>
    %c1_130 = arith.constant 1 : index
    %c0_131 = arith.constant 0 : index
    %c0_132 = arith.constant 0 : index
    %337 = vector.load %arg12[%c1_130, %c0_131, %c0_132] : memref<2x1x128xf32, #tpu.memory_space<vmem>>, vector<1x1x128xf32>
    %338 = vector.shape_cast %337 : vector<1x1x128xf32> to vector<1x128xf32>
    %339 = vector.broadcast %338 : vector<1x128xf32> to vector<16x128xf32>
    %340 = arith.addf %336, %339 : vector<16x128xf32>
    %cst_133 = arith.constant 5.000000e-01 : f32
    %341 = vector.broadcast %cst_133 : f32 to vector<16x128xf32>
    %342 = arith.mulf %341, %340 : vector<16x128xf32>
    %cst_134 = arith.constant 4.471500e-02 : f32
    %343 = vector.broadcast %cst_134 : f32 to vector<16x128xf32>
    %344 = arith.mulf %343, %340 : vector<16x128xf32>
    %345 = arith.mulf %344, %340 : vector<16x128xf32>
    %346 = arith.mulf %345, %340 : vector<16x128xf32>
    %347 = arith.addf %340, %346 : vector<16x128xf32>
    %cst_135 = arith.constant 0.797884583 : f32
    %348 = vector.broadcast %cst_135 : f32 to vector<16x128xf32>
    %349 = arith.mulf %348, %347 : vector<16x128xf32>
    %350 = math.tanh %349 : vector<16x128xf32>
    %cst_136 = arith.constant 1.000000e+00 : f32
    %351 = vector.broadcast %cst_136 : f32 to vector<16x128xf32>
    %352 = arith.addf %351, %350 : vector<16x128xf32>
    %353 = arith.mulf %342, %352 : vector<16x128xf32>
    %c1_137 = arith.constant 1 : index
    %c0_138 = arith.constant 0 : index
    %c0_139 = arith.constant 0 : index
    %354 = vector.load %arg13[%c1_137, %c0_138, %c0_139] : memref<2x128x32xf32, #tpu.memory_space<vmem>>, vector<1x128x32xf32>
    %355 = vector.shape_cast %354 : vector<1x128x32xf32> to vector<128x32xf32>
    %cst_140 = arith.constant dense<0.000000e+00> : vector<16x32xf32>
    %356 = tpu.matmul %353, %355, %cst_140 {dimension_numbers = #tpu.dot_dimension_numbers<[1], [0], [0], [1], [0, 0, 1, 1], [], []>} : vector<16x128xf32>, vector<128x32xf32>, vector<16x32xf32> -> vector<16x32xf32>
    %c1_141 = arith.constant 1 : index
    %c0_142 = arith.constant 0 : index
    %c0_143 = arith.constant 0 : index
    %357 = vector.load %arg14[%c1_141, %c0_142, %c0_143] : memref<2x1x32xf32, #tpu.memory_space<vmem>>, vector<1x1x32xf32>
    %358 = vector.shape_cast %357 : vector<1x1x32xf32> to vector<1x32xf32>
    %359 = vector.broadcast %358 : vector<1x32xf32> to vector<16x32xf32>
    %360 = arith.addf %356, %359 : vector<16x32xf32>
    %361 = arith.addf %307, %360 : vector<16x32xf32>
    %362 = vector.shape_cast %361 : vector<16x32xf32> to vector<2x8x32xf32>
    %363 = vector.extract_strided_slice %362 {offsets = [0, 7, 0], sizes = [2, 1, 32], strides = [1, 1, 1]} : vector<2x8x32xf32> to vector<2x1x32xf32>
    %364 = vector.shape_cast %363 : vector<2x1x32xf32> to vector<2x32xf32>
    %c0_144 = arith.constant 0 : index
    %c0_145 = arith.constant 0 : index
    %365 = vector.load %arg15[%c0_144, %c0_145] : memref<1x32xf32, #tpu.memory_space<vmem>>, vector<1x32xf32>
    %c0_146 = arith.constant 0 : index
    %c0_147 = arith.constant 0 : index
    %366 = vector.load %arg16[%c0_146, %c0_147] : memref<1x32xf32, #tpu.memory_space<vmem>>, vector<1x32xf32>
    %cst_148 = arith.constant dense<0.000000e+00> : vector<2xf32>
    %367 = vector.multi_reduction <add>, %364, %cst_148 [1] : vector<2x32xf32> to vector<2xf32>
    %368 = vector.shape_cast %367 : vector<2xf32> to vector<2x1xf32>
    %cst_149 = arith.constant 3.200000e+01 : f32
    %369 = vector.broadcast %cst_149 : f32 to vector<2x1xf32>
    %370 = arith.divf %368, %369 : vector<2x1xf32>
    %371 = vector.broadcast %370 : vector<2x1xf32> to vector<2x32xf32>
    %372 = arith.subf %364, %371 : vector<2x32xf32>
    %373 = arith.mulf %372, %372 : vector<2x32xf32>
    %cst_150 = arith.constant dense<0.000000e+00> : vector<2xf32>
    %374 = vector.multi_reduction <add>, %373, %cst_150 [1] : vector<2x32xf32> to vector<2xf32>
    %375 = vector.shape_cast %374 : vector<2xf32> to vector<2x1xf32>
    %cst_151 = arith.constant 3.200000e+01 : f32
    %376 = vector.broadcast %cst_151 : f32 to vector<2x1xf32>
    %377 = arith.divf %375, %376 : vector<2x1xf32>
    %378 = vector.broadcast %370 : vector<2x1xf32> to vector<2x32xf32>
    %379 = arith.subf %364, %378 : vector<2x32xf32>
    %cst_152 = arith.constant 9.99999974E-6 : f32
    %380 = vector.broadcast %cst_152 : f32 to vector<2x1xf32>
    %381 = arith.addf %377, %380 : vector<2x1xf32>
    %382 = math.rsqrt %381 : vector<2x1xf32>
    %383 = vector.broadcast %382 : vector<2x1xf32> to vector<2x32xf32>
    %384 = arith.mulf %379, %383 : vector<2x32xf32>
    %385 = vector.broadcast %365 : vector<1x32xf32> to vector<2x32xf32>
    %386 = arith.mulf %384, %385 : vector<2x32xf32>
    %387 = vector.broadcast %366 : vector<1x32xf32> to vector<2x32xf32>
    %388 = arith.addf %386, %387 : vector<2x32xf32>
    %c0_153 = arith.constant 0 : index
    %c0_154 = arith.constant 0 : index
    %389 = vector.load %arg17[%c0_153, %c0_154] : memref<32x128xf32, #tpu.memory_space<vmem>>, vector<32x128xf32>
    %cst_155 = arith.constant dense<0.000000e+00> : vector<2x128xf32>
    %390 = tpu.matmul %388, %389, %cst_155 {dimension_numbers = #tpu.dot_dimension_numbers<[1], [0], [0], [1], [0, 0, 1, 1], [], []>} : vector<2x32xf32>, vector<32x128xf32>, vector<2x128xf32> -> vector<2x128xf32>
    %c0_156 = arith.constant 0 : index
    %c0_157 = arith.constant 0 : index
    %391 = vector.load %arg18[%c0_156, %c0_157] : memref<1x128xf32, #tpu.memory_space<vmem>>, vector<1x128xf32>
    %392 = vector.broadcast %391 : vector<1x128xf32> to vector<2x128xf32>
    %393 = arith.addf %390, %392 : vector<2x128xf32>
    %c0_158 = arith.constant 0 : index
    %c0_159 = arith.constant 0 : index
    %394 = vector.load %arg19[%c0_158, %c0_159] : memref<2x128xf32, #tpu.memory_space<vmem>>, vector<2x128xf32>
    tpu.vector_store %arg19[%c0_158, %c0_159], %393 {strides = array<i32>} : memref<2x128xf32, #tpu.memory_space<vmem>>, vector<2x128xf32>,
    return
  }
  func.func @transform_0(%arg0: i32) -> (i32, i32, i32) {
    %c0_i32 = arith.constant 0 : i32
    %c0_i32_0 = arith.constant 0 : i32
    %c0_i32_1 = arith.constant 0 : i32
    %c0_i32_2 = arith.constant 0 : i32
    return %c0_i32, %c0_i32_0, %c0_i32_1 : i32, i32, i32
  }
  func.func @transform_1(%arg0: i32) -> (i32, i32) {
    %c0_i32 = arith.constant 0 : i32
    %c0_i32_0 = arith.constant 0 : i32
    %c0_i32_1 = arith.constant 0 : i32
    return %c0_i32, %c0_i32_0 : i32, i32
  }
  func.func @transform_2(%arg0: i32) -> (i32, i32, i32) {
    %c0_i32 = arith.constant 0 : i32
    %c0_i32_0 = arith.constant 0 : i32
    %c0_i32_1 = arith.constant 0 : i32
    %c0_i32_2 = arith.constant 0 : i32
    return %c0_i32, %c0_i32_0, %c0_i32_1 : i32, i32, i32
  }
  func.func @transform_3(%arg0: i32) -> (i32, i32, i32) {
    %c0_i32 = arith.constant 0 : i32
    %c0_i32_0 = arith.constant 0 : i32
    %c0_i32_1 = arith.constant 0 : i32
    %c0_i32_2 = arith.constant 0 : i32
    return %c0_i32, %c0_i32_0, %c0_i32_1 : i32, i32, i32
  }
  func.func @transform_4(%arg0: i32) -> (i32, i32, i32) {
    %c0_i32 = arith.constant 0 : i32
    %c0_i32_0 = arith.constant 0 : i32
    %c0_i32_1 = arith.constant 0 : i32
    %c0_i32_2 = arith.constant 0 : i32
    return %c0_i32, %c0_i32_0, %c0_i32_1 : i32, i32, i32
  }
  func.func @transform_5(%arg0: i32) -> (i32, i32, i32) {
    %c0_i32 = arith.constant 0 : i32
    %c0_i32_0 = arith.constant 0 : i32
    %c0_i32_1 = arith.constant 0 : i32
    %c0_i32_2 = arith.constant 0 : i32
    return %c0_i32, %c0_i32_0, %c0_i32_1 : i32, i32, i32
  }
  func.func @transform_6(%arg0: i32) -> (i32, i32, i32) {
    %c0_i32 = arith.constant 0 : i32
    %c0_i32_0 = arith.constant 0 : i32
    %c0_i32_1 = arith.constant 0 : i32
    %c0_i32_2 = arith.constant 0 : i32
    return %c0_i32, %c0_i32_0, %c0_i32_1 : i32, i32, i32
  }
  func.func @transform_7(%arg0: i32) -> (i32, i32, i32) {
    %c0_i32 = arith.constant 0 : i32
    %c0_i32_0 = arith.constant 0 : i32
    %c0_i32_1 = arith.constant 0 : i32
    %c0_i32_2 = arith.constant 0 : i32
    return %c0_i32, %c0_i32_0, %c0_i32_1 : i32, i32, i32
  }
  func.func @transform_8(%arg0: i32) -> (i32, i32, i32) {
    %c0_i32 = arith.constant 0 : i32
    %c0_i32_0 = arith.constant 0 : i32
    %c0_i32_1 = arith.constant 0 : i32
    %c0_i32_2 = arith.constant 0 : i32
    return %c0_i32, %c0_i32_0, %c0_i32_1 : i32, i32, i32
  }
  func.func @transform_9(%arg0: i32) -> (i32, i32, i32) {
    %c0_i32 = arith.constant 0 : i32
    %c0_i32_0 = arith.constant 0 : i32
    %c0_i32_1 = arith.constant 0 : i32
    %c0_i32_2 = arith.constant 0 : i32
    return %c0_i32, %c0_i32_0, %c0_i32_1 : i32, i32, i32
  }
  func.func @transform_10(%arg0: i32) -> (i32, i32, i32) {
    %c0_i32 = arith.constant 0 : i32
    %c0_i32_0 = arith.constant 0 : i32
    %c0_i32_1 = arith.constant 0 : i32
    %c0_i32_2 = arith.constant 0 : i32
    return %c0_i32, %c0_i32_0, %c0_i32_1 : i32, i32, i32
  }
  func.func @transform_11(%arg0: i32) -> (i32, i32, i32) {
    %c0_i32 = arith.constant 0 : i32
    %c0_i32_0 = arith.constant 0 : i32
    %c0_i32_1 = arith.constant 0 : i32
    %c0_i32_2 = arith.constant 0 : i32
    return %c0_i32, %c0_i32_0, %c0_i32_1 : i32, i32, i32
  }
  func.func @transform_12(%arg0: i32) -> (i32, i32, i32) {
    %c0_i32 = arith.constant 0 : i32
    %c0_i32_0 = arith.constant 0 : i32
    %c0_i32_1 = arith.constant 0 : i32
    %c0_i32_2 = arith.constant 0 : i32
    return %c0_i32, %c0_i32_0, %c0_i32_1 : i32, i32, i32
  }
  func.func @transform_13(%arg0: i32) -> (i32, i32, i32) {
    %c0_i32 = arith.constant 0 : i32
    %c0_i32_0 = arith.constant 0 : i32
    %c0_i32_1 = arith.constant 0 : i32
    %c0_i32_2 = arith.constant 0 : i32
    return %c0_i32, %c0_i32_0, %c0_i32_1 : i32, i32, i32
  }
  func.func @transform_14(%arg0: i32) -> (i32, i32) {
    %c0_i32 = arith.constant 0 : i32
    %c0_i32_0 = arith.constant 0 : i32
    %c0_i32_1 = arith.constant 0 : i32
    return %c0_i32, %c0_i32_0 : i32, i32
  }
  func.func @transform_15(%arg0: i32) -> (i32, i32) {
    %c0_i32 = arith.constant 0 : i32
    %c0_i32_0 = arith.constant 0 : i32
    %c0_i32_1 = arith.constant 0 : i32
    return %c0_i32, %c0_i32_0 : i32, i32
  }
  func.func @transform_16(%arg0: i32) -> (i32, i32) {
    %c0_i32 = arith.constant 0 : i32
    %c0_i32_0 = arith.constant 0 : i32
    %c0_i32_1 = arith.constant 0 : i32
    return %c0_i32, %c0_i32_0 : i32, i32
  }
  func.func @transform_17(%arg0: i32) -> (i32, i32) {
    %c0_i32 = arith.constant 0 : i32
    %c0_i32_0 = arith.constant 0 : i32
    %c0_i32_1 = arith.constant 0 : i32
    return %c0_i32, %c0_i32_0 : i32, i32
  }
  func.func @transform_18(%arg0: i32) -> (i32, i32) {
    %c0_i32 = arith.constant 0 : i32
    %c0_i32_0 = arith.constant 0 : i32
    %c0_i32_1 = arith.constant 0 : i32
    return %c0_i32, %c0_i32_0 : i32, i32
  }
}

</mosaic_0001>

<bundles_post_ra>
// kernel: model_forward.1
= control target key start
LH: loop header
LB: loop body
LE: loop exit
PB: predicated region body
PF: predicated region fallthrough
CT: control target
= control target key end

     0   :  { %s5528_s0 = inlined_call_operand.vmem [shape: f32[2,8,32], index: 0, kind: input, shape index: {}]   ;;  %s5529_s1 = inlined_call_operand.vmem [shape: f32[8,32], index: 1, kind: input, shape index: {}]   ;;  %s5530_s2 = inlined_call_operand.vmem [shape: f32[2,1,32], index: 2, kind: input, shape index: {}]   ;;  %s5531_s3 = inlined_call_operand.vmem [shape: f32[2,1,32], index: 3, kind: input, shape index: {}]   ;;  %s5532_s4 = inlined_call_operand.vmem [shape: f32[2,32,96], index: 4, kind: input, shape index: {}]   ;;  %s5533_s5 = inlined_call_operand.vmem [shape: f32[2,1,96], index: 5, kind: input, shape index: {}]   ;;  %s5534_s6 = inlined_call_operand.vmem [shape: f32[2,32,32], index: 6, kind: input, shape index: {}]   ;;  %s5535_s7 = inlined_call_operand.vmem [shape: f32[2,1,32], index: 7, kind: input, shape index: {}]   ;;  %s5536_s8 = inlined_call_operand.vmem [shape: f32[2,1,32], index: 8, kind: input, shape index: {}]   ;;  %s5537_s9 = inlined_call_operand.vmem [shape: f32[2,1,32], index: 9, kind: input, shape index: {}]   ;;  %s5538_s10 = inlined_call_operand.vmem [shape: f32[2,32,128], index: 10, kind: input, shape index: {}]   ;;  %s5539_s11 = inlined_call_operand.vmem [shape: f32[2,1,128], index: 11, kind: input, shape index: {}]   ;;  %s5540_s12 = inlined_call_operand.vmem [shape: f32[2,128,32], index: 12, kind: input, shape index: {}]   ;;  %s5541_s13 = inlined_call_operand.vmem [shape: f32[2,1,32], index: 13, kind: input, shape index: {}]   ;;  %s5542_s14 = inlined_call_operand.vmem [shape: f32[1,32], index: 14, kind: input, shape index: {}]   ;;  %s5543_s15 = inlined_call_operand.vmem [shape: f32[1,32], index: 15, kind: input, shape index: {}]   ;;  %s5544_s16 = inlined_call_operand.vmem [shape: f32[32,128], index: 16, kind: input, shape index: {}]   ;;  %s5545_s17 = inlined_call_operand.vmem [shape: f32[1,128], index: 17, kind: input, shape index: {}]   ;;  %s5546_s18 = inlined_call_operand.hbm [shape: f32[2,128], index: 18, kind: output, shape index: {}]  }
   0x1   :  { %5568 = sst [smem:[#allocation5_spill]] %s5528_s0 }
   0x2   :  { %5569 = sst [smem:[#allocation6_spill]] %s5529_s1 }
   0x3   :  { %5570 = sst [smem:[#allocation7_spill]] %s5530_s2 }
   0x4   :  { %5571 = sst [smem:[#allocation8_spill]] %s5541_s13 }
   0x5   :  { %s5572_s29 = sld [smem:[#allocation5_spill]]  ;;  %s5573_s13 = sld [smem:[#allocation6_spill]]  ;;  %vm73_vm0 = vcmask 261120  }
   0xb   :  { %v60_v0 = vld [vmem:[%s5572_s29] sm:$0xff]  ;;  %v61_v2 = vld [vmem:[%s5572_s29 + $0x8] sm:$0xff] }
   0xc   :  { %v62_v1 = vld [vmem:[%s5573_s13] sm:$0xff] }
   0xd   :  { %v4862_v3 = vadd.f32 %v62_v1, %v60_v0  ;;  %v4864_v4 = vadd.f32 %v62_v1, %v61_v2 }
   0xe   :  { %23 = vsyncpa [#allocation3], 0  ;;  %v117_v17 = vld [vmem:[%s5532_s4] sm:$0xff]  ;;  %v118_v18 = vld [vmem:[%s5532_s4 + $0x8] sm:$0xff]  ;;  %s5574_s28 = sld [smem:[#allocation7_spill]]  ;;  %v4739_v39 = vmov 0.0   ;;  %v65_v47 = vlaneseq }
   0xf   :  { %v74_v5 = vsel %vm73_vm0, %v4862_v3, 0.0  ;;  %v77_v6 = vsel %vm73_vm0, %v4864_v4, 0.0  ;;  %v119_v19 = vld [vmem:[%s5532_s4 + $0x10] sm:$0xff]  ;;  %v4486_v20 = vpack.c.bf16 %v118_v18, %v117_v17  ;;  %v120_v21 = vld [vmem:[%s5532_s4 + $0x18] sm:$0xff]  ;;  %v3923_v32 = vld [vmem:[%s5531_s3] ss:$0 sm:$0xff]  ;;  %4210 = vmatprep.subr.mxu0 %v4739_v39 }
  0x10   :  { %75 = vadd.xlane.f32.xlu0 %v74_v5  ;;  %v4490_v22 = vpack.c.bf16 %v120_v21, %v119_v19  ;;  %vm4740_vm1 = vmmov 0   ;;  %v3924_v40 = vld [vmem:[%s5533_s5] ss:$0 sm:$0xff]  ;;  %s4741_s1 = smov 96   ;;  %vm212_vm2 = vcmask 64512   ;;  %v66_v48 = vshrl.u32 %v65_v47, 7 }
  0x11   :  { %4487 = vmatprep.subr.bf16.mxu1 %v4486_v20  ;;  %4212 = vmatprep.mubr.msk.f32.mxu0 %vm4740_vm1, %v4739_v39  ;;  %v68_v49 = vand.u32 127, %v65_v47  ;;  %v4742_v50 = vmov -inf   ;;  %s4743_s13 = smov 64   ;;  %s4744_s20 = smov 88   ;;  %vm1557_vm4 = vcmask 195584   ;;  %vm1554_vm5 = vcmask 130048  }
  0x12   :  { %4489 = vmatpush3.bf16.msra.mxu1 %v4486_v20  ;;  %s4745_s21 = smov 120   ;;  %s4746_s22 = smov 56   ;;  %vm3759_vm6 = vcmask 261127   ;;  %vm3763_vm7 = vcmask 253952   ;;  %vm3833_vm8 = vcmask 1041409  }
  0x13   :  { %4491 = vmatprep.subr.bf16.mxu1 %v4490_v22  ;;  %vm69_vm3 = vcmp.le.s32.totalorder %v68_v49, %v66_v48  ;;  %s5566_s2 = smov 80   ;;  %s5564_s23 = smov 112  }
  0x14   :  { %78 = vadd.xlane.f32.xlu0 %v77_v6  ;;  %v3922_v30 = vld [vmem:[%s5574_s28] ss:$0 sm:$0xff]  ;;  %v4923_v51 = vsel %vm69_vm3, 0.0, %v4742_v50  ;;  %s5560_s24 = smov 48   ;;  %s5558_s25 = smov 72  }
  0x15   :  { %s5556_s26 = smov 104   ;;  %s5554_s27 = smov 40  }
  0x16   :  { %4493 = vmatpush3.bf16.msra.mxu1 %v4490_v22  ;;  %s5550_s29 = smov 8   ;;  %s5552_s30 = smov 16  }
  0x17   :  { %4190 = vmatprep.subr.mxu1 %v4739_v39  ;;  %s5562_s0 = smov 24   ;;  %s5584_s19 = smov 24  }
  0x9d   :  { %v76_v7 = vpop.xlane.xlu0 %75 }
  0x9e   :  { %v81_v8 = vmul.f32 0.03125, %v76_v7 }
  0xa0   :  { %v83_v9 = vsub.f32 %v4862_v3, %v81_v8 }
  0xa1   :  { %v79_v10 = vpop.xlane.xlu0 %78 }
  0xa2   :  { %v82_v11 = vmul.f32 0.03125, %v79_v10  ;;  %v85_v12 = vmul.f32 %v83_v9, %v83_v9 }
  0xa4   :  { %v84_v13 = vsub.f32 %v4864_v4, %v82_v11  ;;  %v87_v14 = vsel %vm73_vm0, %v85_v12, 0.0 }
  0xa5   :  { %88 = vadd.xlane.f32.xlu1 %v87_v14 }
  0xa6   :  { %v86_v15 = vmul.f32 %v84_v13, %v84_v13 }
  0xa8   :  { %v90_v16 = vsel %vm73_vm0, %v86_v15, 0.0 }
  0xa9   :  { %91 = vadd.xlane.f32.xlu1 %v90_v16 }
 0x132   :  { %v89_v23 = vpop.xlane.xlu1 %88 }
 0x133   :  { %v93_v24 = vmul.f32 0.03125, %v89_v23 }
 0x135   :  { %v95_v25 = vadd.f32 1e-05, %v93_v24 }
 0x136   :  { %v92_v26 = vpop.xlane.xlu1 %91 }
 0x137   :  { %4623 = vrsqrt.f32 %v95_v25  ;;  %v94_v27 = vmul.f32 0.03125, %v92_v26 }
 0x139   :  { %v96_v28 = vadd.f32 1e-05, %v94_v27 }
 0x13b   :  { %4625 = vrsqrt.f32 %v96_v28 }
 0x141   :  { %v4624_v29 = vpop.eup %4623 }
 0x142   :  { %v99_v31 = vmul.f32 %v4624_v29, %v83_v9 }
 0x144   :  { %v107_v33 = vmul.f32 %v3922_v30, %v99_v31 }
 0x145   :  { %v4626_v34 = vpop.eup %4625 }
 0x146   :  { %v100_v35 = vmul.f32 %v4626_v34, %v84_v13  ;;  %v115_v36 = vadd.f32 %v3923_v32, %v107_v33 }
 0x148   :  { %v108_v37 = vmul.f32 %v3922_v30, %v100_v35  ;;  %4187 = vmatprep.mubr.msk.f32.mxu1 %vm73_vm0, %v115_v36 }
 0x14a   :  { %v116_v38 = vadd.f32 %v3923_v32, %v108_v37 }
 0x14c   :  { %4188 = vmatmul.mubr.msk.f32.vlgmr.msra.gmra.mrb[0].mxu1 %vm73_vm0, %v116_v38 }
 0x14d   :  { %4192 = vmatprep.mubr.msk.f32.mxu1 %vm4740_vm1, %v4739_v39 }
 0x21f   :  { %v4189_v41 = vpop.f32.mrb[0].mxu1 }
 0x220   :  { %v4903_v42 = vadd.f32 %v4189_v41, %v3924_v40  ;;  %v200_v43 = vpop.f32.mrb[1].mxu1 }
 0x221   :  { %v4905_v44 = vadd.f32 %v3924_v40, %v200_v43 }
 0x222   :  { %288 = vrot.lane.b32.xlu1 %v4903_v42, %s4741_s1 }
 0x223   :  { %210 = vrot.lane.b32.xlu0 %v4905_v44, %s4741_s1 }
 0x294   :  { %v289_v46 = vpop.permute.xlu1 %288 }
 0x295   :  { %v211_v45 = vpop.permute.xlu0 %210 }
 0x296   :  { %4191 = vmatpush3.xpose.msk.msra.mxu1 %vm212_vm2, %v211_v45 }
 0x297   :  { %4195 = vmatprep.subr.mxu1 %v4739_v39 }
 0x299   :  { %4193 = vmatmul.mubr.msk.f32.vlgmr.msra.gmra.mrb[2].mxu1 %vm212_vm2, %v4905_v44 }
 0x29a   :  { %4196 = vmatpush3.xpose.msk.msra.mxu1 %vm212_vm2, %v289_v46  ;;  %4197 = vmatprep.mubr.msk.f32.mxu1 %vm4740_vm1, %v4739_v39 }
 0x29b   :  { %4200 = vmatprep.subr.mxu1 %v4739_v39 }
 0x29d   :  { %4198 = vmatmul.mubr.msk.f32.vlgmr.msra.gmra.mrb[4].mxu1 %vm212_vm2, %v4903_v42 }
 0x29e   :  { %4202 = vmatprep.mubr.msk.f32.mxu1 %vm4740_vm1, %v4739_v39 }
 0x36c   :  { %v283_v52 = vpop.f32.mrb[2].mxu1 }
 0x36d   :  { %v284_v53 = vadd.f32 %v283_v52, %v4923_v51  ;;  %v4194_v54 = vpop.f32.mrb[3].mxu1 }
 0x36f   :  { %v364_v55 = vsel %vm212_vm2, %v284_v53, -inf }
 0x370   :  { %365 = vmax.xlane.f32.xlu1 %v364_v55  ;;  %v360_v56 = vpop.f32.mrb[4].mxu1 }
 0x371   :  { %v361_v57 = vadd.f32 %v360_v56, %v4923_v51  ;;  %v4199_v58 = vpop.f32.mrb[5].mxu1 }
 0x373   :  { %v367_v59 = vsel %vm212_vm2, %v361_v57, -inf }
 0x374   :  { %368 = vmax.xlane.f32.xlu0 %v367_v59 }
 0x381   :  { %462 = vrot.lane.b32.xlu1 %v4903_v42, %s4743_s13 }
 0x385   :  { %540 = vrot.lane.b32.xlu1 %v4905_v44, %s4744_s20 }
 0x389   :  { %618 = vrot.lane.b32.xlu1 %v4903_v42, %s4744_s20 }
 0x3fd   :  { %v366_v60 = vpop.xlane.xlu1 %365 }
 0x3fe   :  { %v370_v61 = vsub.f32 %v284_v53, %v366_v60 }
 0x400   :  { %v372_v62 = vmul.f32 1.442695, %v370_v61 }
 0x401   :  { %v463_v63 = vpop.permute.xlu1 %462  ;;  %v369_v0 = vpop.xlane.xlu0 %368 }
 0x402   :  { %4627 = vpow2.f32 %v372_v62  ;;  %v371_v1 = vsub.f32 %v361_v57, %v369_v0 }
 0x404   :  { %v374_v2 = vmul.f32 1.442695, %v371_v1 }
 0x405   :  { %v541_v5 = vpop.permute.xlu1 %540 }
 0x406   :  { %4629 = vpow2.f32 %v374_v2  ;;  %4211 = vmatpush3.xpose.msk.msra.mxu0 %vm212_vm2, %v541_v5 }
 0x407   :  { %4220 = vmatprep.subr.mxu0 %v4739_v39 }
 0x409   :  { %v619_v10 = vpop.permute.xlu1 %618 }
 0x40c   :  { %v4628_v6 = vpop.eup %4627 }
 0x40d   :  { %v376_v7 = vsel %vm212_vm2, %v4628_v6, 0.0 }
 0x40e   :  { %377 = vadd.xlane.f32.xlu0 %v376_v7 }
 0x410   :  { %v4630_v8 = vpop.eup %4629 }
 0x411   :  { %v379_v9 = vsel %vm212_vm2, %v4630_v8, 0.0 }
 0x412   :  { %380 = vadd.xlane.f32.xlu1 %v379_v9 }
 0x423   :  { %616 = vrot.lane.b32.xlu1 %v4903_v42, %s4745_s21 }
 0x424   :  { %386 = vrot.lane.b32.xlu0 %v4905_v44, %s4743_s13 }
 0x428   :  { %538 = vrot.lane.b32.xlu0 %v4905_v44, %s4745_s21 }
 0x49b   :  { %v378_v11 = vpop.xlane.xlu0 %377 }
 0x49c   :  { %4631 = vrcp.f32 %v378_v11 }
 0x49f   :  { %v381_v12 = vpop.xlane.xlu1 %380  ;;  %v387_v13 = vpop.permute.xlu0 %386 }
 0x4a0   :  { %4633 = vrcp.f32 %v381_v12  ;;  %4201 = vmatpush3.msra.mxu1 %v387_v13 }
 0x4a1   :  { %4205 = vmatprep.subr.mxu1 %v4739_v39 }
 0x4a3   :  { %v539_v14 = vpop.permute.xlu0 %538  ;;  %v617_v19 = vpop.permute.xlu1 %616 }
 0x4a4   :  { %4213 = vmatmul.mubr.msk.f32.vlgmr.msra.gmra.mrb[0].mxu0 %vm212_vm2, %v539_v14 }
 0x4a5   :  { %4222 = vmatprep.mubr.msk.f32.mxu0 %vm4740_vm1, %v4739_v39 }
 0x4a6   :  { %v4632_v15 = vpop.eup %4631 }
 0x4a7   :  { %v384_v16 = vmul.f32 %v4632_v15, %v4628_v6 }
 0x4a9   :  { %4203 = vmatmul.mubr.msk.f32.vlgmr.msra.gmra.mrb[6].mxu1 %vm212_vm2, %v384_v16 }
 0x4aa   :  { %v4634_v17 = vpop.eup %4633  ;;  %4206 = vmatpush3.msra.mxu1 %v463_v63  ;;  %4207 = vmatprep.mubr.msk.f32.mxu1 %vm4740_vm1, %v4739_v39 }
 0x4ab   :  { %v385_v18 = vmul.f32 %v4634_v17, %v4630_v8  ;;  %4215 = vmatprep.subr.mxu1 %v4739_v39 }
 0x4ad   :  { %4208 = vmatmul.mubr.msk.f32.vlgmr.msra.gmra.mrb[8].mxu1 %vm212_vm2, %v385_v18 }
 0x4ae   :  { %4217 = vmatprep.mubr.msk.f32.mxu1 %vm4740_vm1, %v4739_v39 }
 0x4b1   :  { %4216 = vmatpush3.xpose.msk.msra.mxu1 %vm212_vm2, %v619_v10 }
 0x4b2   :  { %4225 = vmatprep.subr.mxu1 %v4739_v39 }
 0x4b4   :  { %4218 = vmatmul.mubr.msk.f32.vlgmr.msra.gmra.mrb[10].mxu1 %vm212_vm2, %v617_v19 }
 0x4b5   :  { %4227 = vmatprep.mubr.msk.f32.mxu1 %vm4740_vm1, %v4739_v39 }
 0x577   :  { %v612_v20 = vpop.f32.mrb[0].mxu0 }
 0x578   :  { %v613_v21 = vadd.f32 %v612_v20, %v4923_v51  ;;  %v4214_v22 = vpop.f32.mrb[1].mxu0 }
 0x57a   :  { %v694_v23 = vsel %vm212_vm2, %v613_v21, -inf }
 0x57b   :  { %695 = vmax.xlane.f32.xlu0 %v694_v23 }
 0x57c   :  { %v4963_v24 = vpop.f32.mrb[6].mxu1 }
 0x57d   :  { %v4204_v25 = vpop.f32.mrb[7].mxu1 }
 0x580   :  { %v4965_v26 = vpop.f32.mrb[8].mxu1 }
 0x581   :  { %v4209_v27 = vpop.f32.mrb[9].mxu1 }
 0x587   :  { %v690_v28 = vpop.f32.mrb[10].mxu1 }
 0x588   :  { %v691_v29 = vadd.f32 %v690_v28, %v4923_v51  ;;  %v4219_v30 = vpop.f32.mrb[11].mxu1 }
 0x58a   :  { %v697_v31 = vsel %vm212_vm2, %v691_v29, -inf }
 0x58b   :  { %698 = vmax.xlane.f32.xlu1 %v697_v31 }
 0x59c   :  { %792 = vrot.lane.b32.xlu1 %v4903_v42, %s4746_s22 }
 0x5a0   :  { %870 = vrot.lane.b32.xlu1 %v4905_v44, %s5566_s2 }
 0x5a4   :  { %948 = vrot.lane.b32.xlu1 %v4903_v42, %s5566_s2 }
 0x5a8   :  { %946 = vrot.lane.b32.xlu1 %v4903_v42, %s5564_s23 }
 0x608   :  { %v696_v32 = vpop.xlane.xlu0 %695 }
 0x609   :  { %v700_v33 = vsub.f32 %v613_v21, %v696_v32 }
 0x60b   :  { %v702_v34 = vmul.f32 1.442695, %v700_v33 }
 0x60d   :  { %4635 = vpow2.f32 %v702_v34 }
 0x617   :  { %v4636_v35 = vpop.eup %4635 }
 0x618   :  { %v699_v36 = vpop.xlane.xlu1 %698  ;;  %v706_v37 = vsel %vm212_vm2, %v4636_v35, 0.0 }
 0x619   :  { %707 = vadd.xlane.f32.xlu0 %v706_v37  ;;  %v701_v40 = vsub.f32 %v691_v29, %v699_v36 }
 0x61b   :  { %v704_v41 = vmul.f32 1.442695, %v701_v40 }
 0x61c   :  { %v793_v38 = vpop.permute.xlu1 %792 }
 0x61d   :  { %4226 = vmatpush3.msra.mxu1 %v793_v38  ;;  %4637 = vpow2.f32 %v704_v41 }
 0x61e   :  { %4235 = vmatprep.subr.mxu1 %v4739_v39 }
 0x620   :  { %v871_v50 = vpop.permute.xlu1 %870 }
 0x624   :  { %v949_v55 = vpop.permute.xlu1 %948 }
 0x627   :  { %v4638_v43 = vpop.eup %4637 }
 0x628   :  { %v709_v45 = vsel %vm212_vm2, %v4638_v43, 0.0  ;;  %v947_v57 = vpop.permute.xlu1 %946 }
 0x62f   :  { %716 = vrot.lane.b32.xlu0 %v4905_v44, %s4746_s22 }
 0x64e   :  { %710 = vadd.xlane.f32.xlu0 %v709_v45 }
 0x664   :  { %868 = vrot.lane.b32.xlu0 %v4905_v44, %s5564_s23  ;;  %s5575_s23 = sld [smem:[#allocation8_spill]] }
 0x6a6   :  { %v708_v46 = vpop.xlane.xlu0 %707 }
 0x6a7   :  { %4639 = vrcp.f32 %v708_v46 }
 0x6aa   :  { %v717_v47 = vpop.permute.xlu0 %716 }
 0x6ab   :  { %4221 = vmatpush3.msra.mxu0 %v717_v47 }
 0x6ac   :  { %4230 = vmatprep.subr.mxu0 %v4739_v39 }
 0x6b1   :  { %v4640_v48 = vpop.eup %4639 }
 0x6b2   :  { %v714_v49 = vmul.f32 %v4640_v48, %v4636_v35 }
 0x6b4   :  { %4223 = vmatmul.mubr.msk.f32.vlgmr.msra.gmra.mrb[2].mxu0 %vm212_vm2, %v714_v49 }
 0x6b5   :  { %4231 = vmatpush3.xpose.msk.msra.mxu0 %vm212_vm2, %v871_v50  ;;  %4232 = vmatprep.mubr.msk.f32.mxu0 %vm4740_vm1, %v4739_v39 }
 0x6b6   :  { %4240 = vmatprep.subr.mxu0 %v4739_v39 }
 0x6db   :  { %v711_v52 = vpop.xlane.xlu0 %710 }
 0x6dc   :  { %4641 = vrcp.f32 %v711_v52 }
 0x6df   :  { %v869_v53 = vpop.permute.xlu0 %868 }
 0x6e0   :  { %4233 = vmatmul.mubr.msk.f32.vlgmr.msra.gmra.mrb[4].mxu0 %vm212_vm2, %v869_v53 }
 0x6e1   :  { %4242 = vmatprep.mubr.msk.f32.mxu0 %vm4740_vm1, %v4739_v39 }
 0x6e6   :  { %v4642_v54 = vpop.eup %4641 }
 0x6e7   :  { %v715_v56 = vmul.f32 %v4642_v54, %v4638_v43 }
 0x6e9   :  { %4228 = vmatmul.mubr.msk.f32.vlgmr.msra.gmra.mrb[12].mxu1 %vm212_vm2, %v715_v56 }
 0x6ea   :  { %4236 = vmatpush3.xpose.msk.msra.mxu1 %vm212_vm2, %v949_v55  ;;  %4237 = vmatprep.mubr.msk.f32.mxu1 %vm4740_vm1, %v4739_v39 }
 0x6eb   :  { %4245 = vmatprep.subr.mxu1 %v4739_v39 }
 0x6ed   :  { %4238 = vmatmul.mubr.msk.f32.vlgmr.msra.gmra.mrb[14].mxu1 %vm212_vm2, %v947_v57 }
 0x6ee   :  { %4247 = vmatprep.mubr.msk.f32.mxu1 %vm4740_vm1, %v4739_v39 }
 0x787   :  { %v5001_v58 = vpop.f32.mrb[2].mxu0 }
 0x788   :  { %v4224_v59 = vpop.f32.mrb[3].mxu0 }
 0x7b3   :  { %v942_v60 = vpop.f32.mrb[4].mxu0 }
 0x7b4   :  { %v943_v61 = vadd.f32 %v942_v60, %v4923_v51  ;;  %v4234_v62 = vpop.f32.mrb[5].mxu0 }
 0x7b6   :  { %v1024_v63 = vsel %vm212_vm2, %v943_v61, -inf }
 0x7b7   :  { %1025 = vmax.xlane.f32.xlu0 %v1024_v63 }
 0x7bc   :  { %v5005_v0 = vpop.f32.mrb[12].mxu1 }
 0x7bd   :  { %v4229_v1 = vpop.f32.mrb[13].mxu1 }
 0x7be   :  { %v1561_v1 = vld [vmem:[%s5534_s6 + $0x8] sm:$0xff] }
 0x7c0   :  { %v1020_v2 = vpop.f32.mrb[14].mxu1 }
 0x7c1   :  { %v1021_v5 = vadd.f32 %v1020_v2, %v4923_v51  ;;  %v4239_v6 = vpop.f32.mrb[15].mxu1 }
 0x7c2   :  { %v1563_v6 = vld [vmem:[%s5534_s6 + $0x18] sm:$0xff] }
 0x7c3   :  { %v1027_v7 = vsel %vm212_vm2, %v1021_v5, -inf }
 0x7c4   :  { %1028 = vmax.xlane.f32.xlu1 %v1027_v7 }
 0x7d5   :  { %1122 = vrot.lane.b32.xlu1 %v4903_v42, %s5560_s24 }
 0x7d9   :  { %1200 = vrot.lane.b32.xlu1 %v4905_v44, %s5558_s25 }
 0x7dd   :  { %1278 = vrot.lane.b32.xlu1 %v4903_v42, %s5558_s25 }
 0x7e1   :  { %1276 = vrot.lane.b32.xlu1 %v4903_v42, %s5556_s26 }
 0x844   :  { %v1026_v8 = vpop.xlane.xlu0 %1025 }
 0x845   :  { %v1030_v9 = vsub.f32 %v943_v61, %v1026_v8 }
 0x847   :  { %v1032_v10 = vmul.f32 1.442695, %v1030_v9 }
 0x849   :  { %4643 = vpow2.f32 %v1032_v10 }
 0x851   :  { %v1029_v11 = vpop.xlane.xlu1 %1028 }
 0x852   :  { %v1031_v15 = vsub.f32 %v1021_v5, %v1029_v11  ;;  %v1562_v5 = vld [vmem:[%s5534_s6 + $0x10] sm:$0xff] }
 0x853   :  { %v4644_v12 = vpop.eup %4643  ;;  %v4498_v7 = vpack.c.bf16 %v1563_v6, %v1562_v5  ;;  %v1810_v6 = vld [vmem:[%s5540_s12 + $0x10] sm:$0xff] }
 0x854   :  { %v1036_v13 = vsel %vm212_vm2, %v4644_v12, 0.0  ;;  %v1034_v16 = vmul.f32 1.442695, %v1031_v15 }
 0x855   :  { %1037 = vadd.xlane.f32.xlu0 %v1036_v13  ;;  %v1123_v14 = vpop.permute.xlu1 %1122 }
 0x856   :  { %4246 = vmatpush3.msra.mxu1 %v1123_v14  ;;  %4645 = vpow2.f32 %v1034_v16 }
 0x857   :  { %4255 = vmatprep.subr.mxu1 %v4739_v39 }
 0x859   :  { %v1201_v23 = vpop.permute.xlu1 %1200 }
 0x85d   :  { %v1279_v29 = vpop.permute.xlu1 %1278 }
 0x860   :  { %v4646_v17 = vpop.eup %4645 }
 0x861   :  { %v1039_v18 = vsel %vm212_vm2, %v4646_v17, 0.0  ;;  %v1277_v31 = vpop.permute.xlu1 %1276 }
 0x86b   :  { %1046 = vrot.lane.b32.xlu0 %v4905_v44, %s5560_s24  ;;  %s5583_s24 = smov 16  }
 0x88a   :  { %1040 = vadd.xlane.f32.xlu0 %v1039_v18 }
 0x8a0   :  { %1198 = vrot.lane.b32.xlu0 %v4905_v44, %s5556_s26 }
 0x8e2   :  { %v1038_v19 = vpop.xlane.xlu0 %1037 }
 0x8e3   :  { %4647 = vrcp.f32 %v1038_v19 }
 0x8e6   :  { %v1047_v20 = vpop.permute.xlu0 %1046 }
 0x8e7   :  { %4241 = vmatpush3.msra.mxu0 %v1047_v20 }
 0x8e8   :  { %4250 = vmatprep.subr.mxu0 %v4739_v39 }
 0x8ed   :  { %v4648_v21 = vpop.eup %4647 }
 0x8ee   :  { %v1044_v22 = vmul.f32 %v4648_v21, %v4644_v12 }
 0x8f0   :  { %4243 = vmatmul.mubr.msk.f32.vlgmr.msra.gmra.mrb[6].mxu0 %vm212_vm2, %v1044_v22 }
 0x8f1   :  { %4251 = vmatpush3.xpose.msk.msra.mxu0 %vm212_vm2, %v1201_v23  ;;  %4252 = vmatprep.mubr.msk.f32.mxu0 %vm4740_vm1, %v4739_v39 }
 0x8f2   :  { %4260 = vmatprep.subr.mxu0 %v4739_v39 }
 0x917   :  { %v1041_v25 = vpop.xlane.xlu0 %1040 }
 0x918   :  { %4649 = vrcp.f32 %v1041_v25 }
 0x91b   :  { %v1199_v27 = vpop.permute.xlu0 %1198 }
 0x91c   :  { %4253 = vmatmul.mubr.msk.f32.vlgmr.msra.gmra.mrb[8].mxu0 %vm212_vm2, %v1199_v27 }
 0x91d   :  { %4262 = vmatprep.mubr.msk.f32.mxu0 %vm4740_vm1, %v4739_v39 }
 0x922   :  { %v4650_v28 = vpop.eup %4649 }
 0x923   :  { %v1045_v30 = vmul.f32 %v4650_v28, %v4646_v17 }
 0x925   :  { %4248 = vmatmul.mubr.msk.f32.vlgmr.msra.gmra.mrb[16].mxu1 %vm212_vm2, %v1045_v30 }
 0x926   :  { %4256 = vmatpush3.xpose.msk.msra.mxu1 %vm212_vm2, %v1279_v29  ;;  %4257 = vmatprep.mubr.msk.f32.mxu1 %vm4740_vm1, %v4739_v39 }
 0x927   :  { %4265 = vmatprep.subr.mxu1 %v4739_v39 }
 0x929   :  { %4258 = vmatmul.mubr.msk.f32.vlgmr.msra.gmra.mrb[18].mxu1 %vm212_vm2, %v1277_v31 }
 0x92a   :  { %4267 = vmatprep.mubr.msk.f32.mxu1 %vm4740_vm1, %v4739_v39 }
 0x9c3   :  { %v1118_v32 = vpop.f32.mrb[6].mxu0 }
 0x9c4   :  { %v4244_v33 = vpop.f32.mrb[7].mxu0 }
 0x9ef   :  { %v1272_v34 = vpop.f32.mrb[8].mxu0 }
 0x9f0   :  { %v1273_v35 = vadd.f32 %v1272_v34, %v4923_v51  ;;  %v4254_v36 = vpop.f32.mrb[9].mxu0 }
 0x9f2   :  { %v1354_v37 = vsel %vm212_vm2, %v1273_v35, -inf }
 0x9f3   :  { %1355 = vmax.xlane.f32.xlu0 %v1354_v37 }
 0x9f8   :  { %v1194_v38 = vpop.f32.mrb[16].mxu1 }
 0x9f9   :  { %v4249_v40 = vpop.f32.mrb[17].mxu1 }
 0x9fc   :  { %v1350_v41 = vpop.f32.mrb[18].mxu1 }
 0x9fd   :  { %v1351_v43 = vadd.f32 %v1350_v41, %v4923_v51  ;;  %v4259_v45 = vpop.f32.mrb[19].mxu1 }
 0x9fe   :  { %v1699_v45 = vld [vmem:[%s5538_s10 + $0x8] sm:$0xff] }
 0x9ff   :  { %v1357_v46 = vsel %vm212_vm2, %v1351_v43, -inf }
 0xa00   :  { %1358 = vmax.xlane.f32.xlu1 %v1357_v46 }
 0xa11   :  { %1452 = vrot.lane.b32.xlu1 %v4903_v42, %s5554_s27 }
 0xa15   :  { %1530 = vrot.lane.b32.xlu1 %v5001_v58, %s5550_s29 }
 0xa19   :  { %1532 = vrot.lane.b32.xlu1 %v5005_v0, %s5550_s29 }
 0xa1d   :  { %1540 = vrot.lane.b32.xlu1 %v1194_v38, %s5552_s30 }
 0xa80   :  { %v1356_v47 = vpop.xlane.xlu0 %1355 }
 0xa81   :  { %v1360_v48 = vsub.f32 %v1273_v35, %v1356_v47  ;;  %v1700_v47 = vld [vmem:[%s5538_s10 + $0x10] sm:$0xff] }
 0xa83   :  { %v1362_v49 = vmul.f32 1.442695, %v1360_v48  ;;  %v1701_v48 = vld [vmem:[%s5538_s10 + $0x18] sm:$0xff] }
 0xa85   :  { %4651 = vpow2.f32 %v1362_v49  ;;  %v4506_v49 = vpack.c.bf16 %v1701_v48, %v1700_v47 }
 0xa8d   :  { %v1359_v50 = vpop.xlane.xlu1 %1358 }
 0xa8e   :  { %v1361_v52 = vsub.f32 %v1351_v43, %v1359_v50  ;;  %v1698_v43 = vld [vmem:[%s5538_s10] sm:$0xff] }
 0xa8f   :  { %v4652_v53 = vpop.eup %4651  ;;  %v4502_v46 = vpack.c.bf16 %v1699_v45, %v1698_v43  ;;  %v1808_v50 = vld [vmem:[%s5540_s12] sm:$0xff] }
 0xa90   :  { %v1364_v54 = vmul.f32 1.442695, %v1361_v52  ;;  %v1366_v42 = vsel %vm212_vm2, %v4652_v53, 0.0  ;;  %v1809_v52 = vld [vmem:[%s5540_s12 + $0x8] sm:$0xff] }
 0xa91   :  { %1367 = vadd.xlane.f32.xlu0 %v1366_v42  ;;  %v1453_v55 = vpop.permute.xlu1 %1452 }
 0xa92   :  { %4653 = vpow2.f32 %v1364_v54  ;;  %4266 = vmatpush3.msra.mxu1 %v1453_v55 }
 0xa93   :  { %4503 = vmatprep.subr.bf16.mxu1 %v4502_v46 }
 0xa95   :  { %v1531_v12 = vpop.permute.xlu1 %1530 }
 0xa96   :  { %v1552_v15 = vsel %vm212_vm2, %v4963_v24, %v1531_v12  ;;  %v3951_v24 = vld [vmem:[%s5535_s7] ss:$0 sm:$0xff]  ;;  %v1814_v12 = vld [vmem:[%s5540_s12 + $0x30] sm:$0xff] }
 0xa99   :  { %v1533_v14 = vpop.permute.xlu1 %1532 }
 0xa9a   :  { %v1553_v20 = vsel %vm212_vm2, %v4965_v26, %v1533_v14 }
 0xa9c   :  { %v4654_v56 = vpop.eup %4653 }
 0xa9d   :  { %v1369_v57 = vsel %vm212_vm2, %v4654_v56, 0.0  ;;  %v1541_v19 = vpop.permute.xlu1 %1540 }
 0xa9e   :  { %1370 = vadd.xlane.f32.xlu0 %v1369_v57  ;;  %v1556_v21 = vsel %vm1554_vm5, %v1553_v20, %v1541_v19  ;;  %v1819_v19 = vld [vmem:[%s5540_s12 + $0x58] sm:$0xff] }
 0xab4   :  { %1376 = vrot.lane.b32.xlu0 %v4905_v44, %s5554_s27  ;;  %v1560_v44 = vld [vmem:[%s5534_s6] sm:$0xff] }
 0xab5   :  { %v4494_v2 = vpack.c.bf16 %v1561_v1, %v1560_v44 }
 0xab8   :  { %1538 = vrot.lane.b32.xlu0 %v1118_v32, %s5552_s30 }
 0xb1e   :  { %v1368_v58 = vpop.xlane.xlu0 %1367 }
 0xb1f   :  { %4655 = vrcp.f32 %v1368_v58 }
 0xb29   :  { %v4656_v60 = vpop.eup %4655 }
 0xb2a   :  { %v1374_v61 = vmul.f32 %v4656_v60, %v4652_v53  ;;  %v4510_v53 = vpack.c.bf16 %v1809_v52, %v1808_v50  ;;  %v3954_v60 = vld [vmem:[%s5536_s8] ss:$0 sm:$0xff] }
 0xb2b   :  { %v1371_v59 = vpop.xlane.xlu0 %1370 }
 0xb2c   :  { %4657 = vrcp.f32 %v1371_v59 }
 0xb2f   :  { %v1377_v62 = vpop.permute.xlu0 %1376 }
 0xb30   :  { %4261 = vmatpush3.msra.mxu0 %v1377_v62  ;;  %v3955_v62 = vld [vmem:[%s5537_s9] ss:$0 sm:$0xff] }
 0xb31   :  { %4263 = vmatmul.mubr.msk.f32.vlgmr.msra.gmra.mrb[10].mxu0 %vm212_vm2, %v1374_v61  ;;  %4495 = vmatprep.subr.bf16.mxu0 %v4494_v2 }
 0xb32   :  { %4497 = vmatpush3.bf16.msra.mxu0 %v4494_v2 }
 0xb33   :  { %4499 = vmatprep.subr.bf16.mxu0 %v4498_v7  ;;  %v1539_v13 = vpop.permute.xlu0 %1538 }
 0xb34   :  { %v1555_v16 = vsel %vm1554_vm5, %v1552_v15, %v1539_v13  ;;  %v1815_v13 = vld [vmem:[%s5540_s12 + $0x38] sm:$0xff]  ;;  %v1816_v15 = vld [vmem:[%s5540_s12 + $0x40] sm:$0xff] }
 0xb35   :  { %v4522_v14 = vpack.c.bf16 %v1815_v13, %v1814_v12 }
 0xb36   :  { %v4658_v63 = vpop.eup %4657  ;;  %4501 = vmatpush3.bf16.msra.mxu0 %v4498_v7  ;;  %v1811_v7 = vld [vmem:[%s5540_s12 + $0x18] sm:$0xff] }
 0xb37   :  { %v1375_v0 = vmul.f32 %v4658_v63, %v4654_v56  ;;  %4511 = vmatprep.subr.bf16.mxu0 %v4510_v53 }
 0xb39   :  { %4268 = vmatmul.mubr.msk.f32.vlgmr.msra.gmra.mrb[20].mxu1 %vm212_vm2, %v1375_v0 }
 0xb3a   :  { %4505 = vmatpush3.bf16.msra.mxu1 %v4502_v46 }
 0xb3b   :  { %4507 = vmatprep.subr.bf16.mxu1 %v4506_v49 }
 0xb3e   :  { %4509 = vmatpush3.bf16.msra.mxu1 %v4506_v49 }
 0xc04   :  { %v1448_v8 = vpop.f32.mrb[10].mxu0 }
 0xc05   :  { %1546 = vrot.lane.b32.xlu0 %v1448_v8, %s5562_s0  ;;  %v4264_v9 = vpop.f32.mrb[11].mxu0  ;;  %v4514_v8 = vpack.c.bf16 %v1811_v7, %v1810_v6  ;;  %v3964_v7 = vld [vmem:[%s5532_s4 + $0x20] sm:$0xff] }
 0xc06   :  { %v1812_v9 = vld [vmem:[%s5540_s12 + $0x20] sm:$0xff] }
 0xc0c   :  { %v1524_v10 = vpop.f32.mrb[20].mxu1 }
 0xc0d   :  { %1548 = vrot.lane.b32.xlu1 %v1524_v10, %s5562_s0  ;;  %v4269_v11 = vpop.f32.mrb[21].mxu1  ;;  %v1813_v10 = vld [vmem:[%s5540_s12 + $0x28] sm:$0xff] }
 0xc0e   :  { %v4518_v11 = vpack.c.bf16 %v1813_v10, %v1812_v9  ;;  %v3966_v10 = vld [vmem:[%s5532_s4 + $0x30] sm:$0xff] }
 0xc77   :  { %v1547_v17 = vpop.permute.xlu0 %1546 }
 0xc78   :  { %v1558_v18 = vsel %vm1557_vm4, %v1555_v16, %v1547_v17  ;;  %v1817_v16 = vld [vmem:[%s5540_s12 + $0x48] sm:$0xff] }
 0xc79   :  { %4278 = vmatprep.mubr.msk.f32.mxu0 %vm73_vm0, %v1558_v18  ;;  %v4526_v17 = vpack.c.bf16 %v1817_v16, %v1816_v15  ;;  %v1818_v18 = vld [vmem:[%s5540_s12 + $0x50] sm:$0xff] }
 0xc7a   :  { %v4530_v20 = vpack.c.bf16 %v1819_v19, %v1818_v18 }
 0xc7f   :  { %v1549_v22 = vpop.permute.xlu1 %1548 }
 0xc80   :  { %v1559_v23 = vsel %vm1557_vm4, %v1556_v21, %v1549_v22  ;;  %v1820_v21 = vld [vmem:[%s5540_s12 + $0x60] sm:$0xff]  ;;  %v1821_v22 = vld [vmem:[%s5540_s12 + $0x68] sm:$0xff] }
 0xc81   :  { %4279 = vmatmul.mubr.msk.f32.vlgmr.msra.gmra.mrb[12].mxu0 %vm73_vm0, %v1559_v23  ;;  %v4534_v23 = vpack.c.bf16 %v1821_v22, %v1820_v21 }
 0xc82   :  { %4513 = vmatpush3.bf16.msra.mxu0 %v4510_v53 }
 0xc83   :  { %4515 = vmatprep.subr.bf16.mxu0 %v4514_v8 }
 0xc86   :  { %4517 = vmatpush3.bf16.msra.mxu0 %v4514_v8  ;;  %v3965_v8 = vld [vmem:[%s5532_s4 + $0x28] sm:$0xff] }
 0xc87   :  { %4519 = vmatprep.subr.bf16.mxu0 %v4518_v11  ;;  %v4542_v9 = vpack.c.bf16 %v3965_v8, %v3964_v7 }
 0xc89   :  { %4543 = vmatprep.subr.bf16.mxu1 %v4542_v9 }
 0xc8a   :  { %4521 = vmatpush3.bf16.msra.mxu0 %v4518_v11  ;;  %v3967_v11 = vld [vmem:[%s5532_s4 + $0x38] sm:$0xff] }
 0xc8b   :  { %4523 = vmatprep.subr.bf16.mxu0 %v4522_v14  ;;  %v4546_v12 = vpack.c.bf16 %v3967_v11, %v3966_v10 }
 0xc8e   :  { %4525 = vmatpush3.bf16.msra.mxu0 %v4522_v14 }
 0xc8f   :  { %4527 = vmatprep.subr.bf16.mxu0 %v4526_v17 }
 0xc92   :  { %4529 = vmatpush3.bf16.msra.mxu0 %v4526_v17 }
 0xc93   :  { %4531 = vmatprep.subr.bf16.mxu0 %v4530_v20 }
 0xc96   :  { %4533 = vmatpush3.bf16.msra.mxu0 %v4530_v20  ;;  %v3962_v20 = vld [vmem:[%s5574_s28 + $0x1] ss:$0 sm:$0xff] }
 0xc97   :  { %4535 = vmatprep.subr.bf16.mxu0 %v4534_v23 }
 0xc9a   :  { %4537 = vmatpush3.bf16.msra.mxu0 %v4534_v23 }
 0xd54   :  { %v4280_v25 = vpop.f32.mrb[12].mxu0 }
 0xd55   :  { %v1649_v27 = vadd.f32 %v4280_v25, %v3951_v24  ;;  %v1643_v28 = vpop.f32.mrb[13].mxu0  ;;  %v1823_v25 = vld [vmem:[%s5540_s12 + $0x78] sm:$0xff] }
 0xd56   :  { %v1644_v29 = vadd.f32 %v3951_v24, %v1643_v28  ;;  %v1822_v24 = vld [vmem:[%s5540_s12 + $0x70] sm:$0xff]  ;;  %v3956_v28 = vld [vmem:[%s5539_s11] ss:$0 sm:$0xff] }
 0xd57   :  { %v5087_v30 = vadd.f32 %v1649_v27, %v4864_v4  ;;  %v4538_v27 = vpack.c.bf16 %v1823_v25, %v1822_v24  ;;  %v3963_v24 = vld [vmem:[%s5531_s3 + $0x1] ss:$0 sm:$0xff]  ;;  %s5576_s3 = smov 80  }
 0xd58   :  { %v5090_v26 = vadd.f32 %v1644_v29, %v4862_v3 }
 0xd59   :  { %v1659_v31 = vsel %vm73_vm0, %v5087_v30, 0.0  ;;  %4539 = vmatprep.subr.bf16.mxu0 %v4538_v27 }
 0xd5a   :  { %1660 = vadd.xlane.f32.xlu1 %v1659_v31  ;;  %v1656_v32 = vsel %vm73_vm0, %v5090_v26, 0.0  ;;  %4541 = vmatpush3.bf16.msra.mxu0 %v4538_v27 }
 0xd5b   :  { %1657 = vadd.xlane.f32.xlu0 %v1656_v32  ;;  %4368 = vmatprep.subr.mxu0 %v4739_v39 }
 0xde7   :  { %v1661_v33 = vpop.xlane.xlu1 %1660 }
 0xde8   :  { %v1663_v34 = vmul.f32 0.03125, %v1661_v33  ;;  %v1658_v35 = vpop.xlane.xlu0 %1657 }
 0xde9   :  { %v1662_v36 = vmul.f32 0.03125, %v1658_v35 }
 0xdea   :  { %v1665_v37 = vsub.f32 %v5087_v30, %v1663_v34 }
 0xdeb   :  { %v1664_v4 = vsub.f32 %v5090_v26, %v1662_v36 }
 0xdec   :  { %v1667_v40 = vmul.f32 %v1665_v37, %v1665_v37 }
 0xded   :  { %v1666_v38 = vmul.f32 %v1664_v4, %v1664_v4 }
 0xdee   :  { %v1671_v41 = vsel %vm73_vm0, %v1667_v40, 0.0 }
 0xdef   :  { %v1668_v3 = vsel %vm73_vm0, %v1666_v38, 0.0 }
 0xdf0   :  { %1669 = vadd.xlane.f32.xlu0 %v1668_v3 }
 0xdf4   :  { %1672 = vadd.xlane.f32.xlu0 %v1671_v41 }
 0xe7d   :  { %v1670_v54 = vpop.xlane.xlu0 %1669 }
 0xe7e   :  { %v1674_v42 = vmul.f32 0.03125, %v1670_v54  ;;  %v3959_v54 = vld [vmem:[%s5575_s23] ss:$0 sm:$0xff] }
 0xe80   :  { %v1676_v55 = vadd.f32 1e-05, %v1674_v42 }
 0xe81   :  { %v1673_v56 = vpop.xlane.xlu0 %1672 }
 0xe82   :  { %4659 = vrsqrt.f32 %v1676_v55  ;;  %v1675_v57 = vmul.f32 0.03125, %v1673_v56 }
 0xe84   :  { %v1677_v58 = vadd.f32 1e-05, %v1675_v57 }
 0xe86   :  { %4661 = vrsqrt.f32 %v1677_v58 }
 0xe8c   :  { %v4660_v59 = vpop.eup %4659 }
 0xe8d   :  { %v1680_v61 = vmul.f32 %v4660_v59, %v1664_v4 }
 0xe8f   :  { %v1688_v63 = vmul.f32 %v3954_v60, %v1680_v61 }
 0xe90   :  { %v4662_v0 = vpop.eup %4661 }
 0xe91   :  { %v1681_v44 = vmul.f32 %v4662_v0, %v1665_v37  ;;  %v1696_v1 = vadd.f32 %v3955_v62, %v1688_v63 }
 0xe93   :  { %v1689_v2 = vmul.f32 %v3954_v60, %v1681_v44  ;;  %4289 = vmatprep.mubr.msk.f32.mxu1 %vm73_vm0, %v1696_v1 }
 0xe95   :  { %v1697_v5 = vadd.f32 %v3955_v62, %v1689_v2 }
 0xe97   :  { %4290 = vmatmul.mubr.msk.f32.vlgmr.msra.gmra.mrb[22].mxu1 %vm73_vm0, %v1697_v5 }
 0xe98   :  { %4545 = vmatpush3.bf16.msra.mxu1 %v4542_v9 }
 0xe99   :  { %4547 = vmatprep.subr.bf16.mxu1 %v4546_v12 }
 0xe9c   :  { %4549 = vmatpush3.bf16.msra.mxu1 %v4546_v12 }
 0xe9d   :  { %4338 = vmatprep.subr.mxu1 %v4739_v39 }
 0xf6a   :  { %v4291_v29 = vpop.f32.mrb[22].mxu1 }
 0xf6b   :  { %v1787_v31 = vadd.f32 %v4291_v29, %v3956_v28  ;;  %v1781_v32 = vpop.f32.mrb[23].mxu1 }
 0xf6c   :  { %v1782_v33 = vadd.f32 %v3956_v28, %v1781_v32 }
 0xf6d   :  { %v1793_v34 = vmul.f32 0.044715, %v1787_v31  ;;  %v1791_v50 = vmul.f32 0.5, %v1787_v31 }
 0xf6e   :  { %v1792_v35 = vmul.f32 0.044715, %v1782_v33  ;;  %v1790_v48 = vmul.f32 0.5, %v1782_v33 }
 0xf6f   :  { %v1795_v36 = vmul.f32 %v1793_v34, %v1787_v31 }
 0xf70   :  { %v1794_v37 = vmul.f32 %v1792_v35, %v1782_v33 }
 0xf71   :  { %v1797_v4 = vmul.f32 %v1795_v36, %v1787_v31 }
 0xf72   :  { %v1796_v38 = vmul.f32 %v1794_v37, %v1782_v33 }
 0xf73   :  { %v1799_v3 = vadd.f32 %v1797_v4, %v1787_v31  ;;  %v3969_v31 = vld [vmem:[%s5533_s5 + $0x1] ss:$0 sm:$0xff]  ;;  %s5577_s5 = smov 112  }
 0xf74   :  { %v1798_v40 = vadd.f32 %v1796_v38, %v1782_v33 }
 0xf75   :  { %v1801_v41 = vmul.f32 0.7978846, %v1799_v3 }
 0xf76   :  { %v1800_v43 = vmul.f32 0.7978846, %v1798_v40 }
 0xf77   :  { %4663 = vtanh.f32 %v1801_v41 }
 0xf78   :  { %4665 = vtanh.f32 %v1800_v43 }
 0xf81   :  { %v4664_v45 = vpop.eup %4663 }
 0xf82   :  { %v4666_v46 = vpop.eup %4665  ;;  %v1805_v47 = vadd.f32 1.0, %v4664_v45 }
 0xf83   :  { %v1804_v49 = vadd.f32 1.0, %v4666_v46 }
 0xf84   :  { %v1807_v53 = vmul.f32 %v1805_v47, %v1791_v50 }
 0xf85   :  { %v1806_v52 = vmul.f32 %v1804_v49, %v1790_v48 }
 0xf87   :  { %4324 = vmatprep.mubr.f32.mxu0 %v1806_v52 }
 0xf88   :  { %4325 = vmatmul.mubr.f32.vlgmr.msra.gmra.mrb[14].mxu0 %v1807_v53 }
 0xf89   :  { %4370 = vmatprep.mubr.msk.f32.mxu0 %vm4740_vm1, %v4739_v39 }
0x105b   :  { %v4326_v42 = vpop.f32.mrb[14].mxu0 }
0x105c   :  { %v1903_v55 = vadd.f32 %v4326_v42, %v3959_v54  ;;  %v1897_v56 = vpop.f32.mrb[15].mxu0 }
0x105d   :  { %v1898_v57 = vadd.f32 %v3959_v54, %v1897_v56 }
0x105e   :  { %v5178_v58 = vadd.f32 %v1903_v55, %v5087_v30 }
0x105f   :  { %v5181_v59 = vadd.f32 %v1898_v57, %v5090_v26 }
0x1060   :  { %v1915_v60 = vsel %vm73_vm0, %v5178_v58, 0.0 }
0x1061   :  { %1916 = vadd.xlane.f32.xlu1 %v1915_v60  ;;  %v1912_v61 = vsel %vm73_vm0, %v5181_v59, 0.0 }
0x1062   :  { %1913 = vadd.xlane.f32.xlu0 %v1912_v61 }
0x10ee   :  { %v1917_v62 = vpop.xlane.xlu1 %1916 }
0x10ef   :  { %v1919_v63 = vmul.f32 0.03125, %v1917_v62  ;;  %v1914_v0 = vpop.xlane.xlu0 %1913 }
0x10f0   :  { %v1918_v44 = vmul.f32 0.03125, %v1914_v0 }
0x10f1   :  { %v1921_v1 = vsub.f32 %v5178_v58, %v1919_v63 }
0x10f2   :  { %v1920_v30 = vsub.f32 %v5181_v59, %v1918_v44 }
0x10f3   :  { %v1923_v2 = vmul.f32 %v1921_v1, %v1921_v1 }
0x10f4   :  { %v1922_v5 = vmul.f32 %v1920_v30, %v1920_v30 }
0x10f5   :  { %v1927_v26 = vsel %vm73_vm0, %v1923_v2, 0.0 }
0x10f6   :  { %1928 = vadd.xlane.f32.xlu1 %v1927_v26  ;;  %v1924_v6 = vsel %vm73_vm0, %v1922_v5, 0.0 }
0x10f7   :  { %1925 = vadd.xlane.f32.xlu0 %v1924_v6 }
0x1183   :  { %v1929_v13 = vpop.xlane.xlu1 %1928 }
0x1184   :  { %v1931_v14 = vmul.f32 0.03125, %v1929_v13  ;;  %v1926_v15 = vpop.xlane.xlu0 %1925 }
0x1185   :  { %v1930_v16 = vmul.f32 0.03125, %v1926_v15 }
0x1186   :  { %v1933_v17 = vadd.f32 1e-05, %v1931_v14 }
0x1187   :  { %v1932_v18 = vadd.f32 1e-05, %v1930_v16 }
0x1188   :  { %4667 = vrsqrt.f32 %v1933_v17 }
0x1189   :  { %4669 = vrsqrt.f32 %v1932_v18 }
0x1192   :  { %v4668_v19 = vpop.eup %4667 }
0x1193   :  { %v4670_v21 = vpop.eup %4669  ;;  %v1937_v22 = vmul.f32 %v4668_v19, %v1921_v1 }
0x1194   :  { %v1936_v23 = vmul.f32 %v4670_v21, %v1920_v30 }
0x1195   :  { %v1945_v25 = vmul.f32 %v3962_v20, %v1937_v22 }
0x1196   :  { %v1944_v27 = vmul.f32 %v3962_v20, %v1936_v23 }
0x1197   :  { %v1953_v29 = vadd.f32 %v3963_v24, %v1945_v25 }
0x1198   :  { %v1952_v28 = vadd.f32 %v3963_v24, %v1944_v27 }
0x119a   :  { %4335 = vmatprep.mubr.msk.f32.mxu1 %vm73_vm0, %v1952_v28 }
0x119b   :  { %4336 = vmatmul.mubr.msk.f32.vlgmr.msra.gmra.mrb[24].mxu1 %vm73_vm0, %v1953_v29 }
0x119c   :  { %4340 = vmatprep.mubr.msk.f32.mxu1 %vm4740_vm1, %v4739_v39 }
0x126e   :  { %v4337_v32 = vpop.f32.mrb[24].mxu1 }
0x126f   :  { %v5217_v33 = vadd.f32 %v4337_v32, %v3969_v31  ;;  %v2039_v34 = vpop.f32.mrb[25].mxu1 }
0x1270   :  { %v5219_v35 = vadd.f32 %v3969_v31, %v2039_v34 }
0x1271   :  { %2126 = vrot.lane.b32.xlu1 %v5217_v33, %s4741_s1 }
0x1272   :  { %2049 = vrot.lane.b32.xlu0 %v5219_v35, %s4741_s1  ;;  %s5578_s1 = smov 48  }
0x12e3   :  { %v2127_v37 = vpop.permute.xlu1 %2126 }
0x12e4   :  { %v2050_v36 = vpop.permute.xlu0 %2049 }
0x12e5   :  { %4339 = vmatpush3.xpose.msk.msra.mxu1 %vm212_vm2, %v2050_v36 }
0x12e6   :  { %4343 = vmatprep.subr.mxu1 %v4739_v39 }
0x12e8   :  { %4341 = vmatmul.mubr.msk.f32.vlgmr.msra.gmra.mrb[26].mxu1 %vm212_vm2, %v5219_v35 }
0x12e9   :  { %4344 = vmatpush3.xpose.msk.msra.mxu1 %vm212_vm2, %v2127_v37  ;;  %4345 = vmatprep.mubr.msk.f32.mxu1 %vm4740_vm1, %v4739_v39 }
0x12ea   :  { %4348 = vmatprep.subr.mxu1 %v4739_v39 }
0x12ec   :  { %4346 = vmatmul.mubr.msk.f32.vlgmr.msra.gmra.mrb[28].mxu1 %vm212_vm2, %v5217_v33 }
0x12ed   :  { %4350 = vmatprep.mubr.msk.f32.mxu1 %vm4740_vm1, %v4739_v39 }
0x13bb   :  { %v2121_v4 = vpop.f32.mrb[26].mxu1 }
0x13bc   :  { %v2122_v38 = vadd.f32 %v2121_v4, %v4923_v51  ;;  %v4342_v3 = vpop.f32.mrb[27].mxu1 }
0x13be   :  { %v2202_v40 = vsel %vm212_vm2, %v2122_v38, -inf }
0x13bf   :  { %2203 = vmax.xlane.f32.xlu1 %v2202_v40  ;;  %v2198_v41 = vpop.f32.mrb[28].mxu1 }
0x13c0   :  { %v2199_v43 = vadd.f32 %v2198_v41, %v4923_v51  ;;  %v4347_v45 = vpop.f32.mrb[29].mxu1 }
0x13c2   :  { %v2205_v46 = vsel %vm212_vm2, %v2199_v43, -inf }
0x13c3   :  { %2206 = vmax.xlane.f32.xlu0 %v2205_v46 }
0x13d0   :  { %2300 = vrot.lane.b32.xlu1 %v5217_v33, %s4743_s13 }
0x13d4   :  { %2378 = vrot.lane.b32.xlu1 %v5219_v35, %s4744_s20 }
0x13d8   :  { %2376 = vrot.lane.b32.xlu1 %v5219_v35, %s4745_s21 }
0x144c   :  { %v2204_v47 = vpop.xlane.xlu1 %2203 }
0x144d   :  { %v2208_v48 = vsub.f32 %v2122_v38, %v2204_v47 }
0x144f   :  { %v2210_v49 = vmul.f32 1.442695, %v2208_v48 }
0x1450   :  { %v2207_v50 = vpop.xlane.xlu0 %2206  ;;  %v2301_v57 = vpop.permute.xlu1 %2300 }
0x1451   :  { %4671 = vpow2.f32 %v2210_v49  ;;  %v2209_v52 = vsub.f32 %v2199_v43, %v2207_v50 }
0x1453   :  { %v2212_v53 = vmul.f32 1.442695, %v2209_v52 }
0x1454   :  { %v2379_v60 = vpop.permute.xlu1 %2378 }
0x1455   :  { %4673 = vpow2.f32 %v2212_v53 }
0x1458   :  { %v2377_v61 = vpop.permute.xlu1 %2376 }
0x145b   :  { %v4672_v54 = vpop.eup %4671 }
0x145c   :  { %v2214_v42 = vsel %vm212_vm2, %v4672_v54, 0.0 }
0x145d   :  { %2215 = vadd.xlane.f32.xlu0 %v2214_v42 }
0x145f   :  { %v4674_v55 = vpop.eup %4673 }
0x1460   :  { %v2217_v56 = vsel %vm212_vm2, %v4674_v55, 0.0 }
0x1461   :  { %2218 = vadd.xlane.f32.xlu1 %v2217_v56 }
0x1472   :  { %2454 = vrot.lane.b32.xlu1 %v5217_v33, %s4745_s21  ;;  %s5581_s21 = smov 40  }
0x1473   :  { %2224 = vrot.lane.b32.xlu0 %v5219_v35, %s4743_s13  ;;  %s5579_s13 = smov 72  }
0x1477   :  { %2456 = vrot.lane.b32.xlu0 %v5217_v33, %s4744_s20  ;;  %s5580_s20 = smov 104  }
0x14ea   :  { %v2216_v62 = vpop.xlane.xlu0 %2215 }
0x14eb   :  { %4675 = vrcp.f32 %v2216_v62 }
0x14ee   :  { %v2219_v63 = vpop.xlane.xlu1 %2218  ;;  %v2225_v0 = vpop.permute.xlu0 %2224 }
0x14ef   :  { %4677 = vrcp.f32 %v2219_v63  ;;  %4349 = vmatpush3.msra.mxu1 %v2225_v0 }
0x14f0   :  { %4353 = vmatprep.subr.mxu1 %v4739_v39 }
0x14f2   :  { %v2457_v5 = vpop.permute.xlu0 %2456  ;;  %v2455_v26 = vpop.permute.xlu1 %2454 }
0x14f5   :  { %v4676_v44 = vpop.eup %4675 }
0x14f6   :  { %v2222_v1 = vmul.f32 %v4676_v44, %v4672_v54 }
0x14f8   :  { %4351 = vmatmul.mubr.msk.f32.vlgmr.msra.gmra.mrb[30].mxu1 %vm212_vm2, %v2222_v1 }
0x14f9   :  { %v4678_v30 = vpop.eup %4677  ;;  %4354 = vmatpush3.msra.mxu1 %v2301_v57  ;;  %4355 = vmatprep.mubr.msk.f32.mxu1 %vm4740_vm1, %v4739_v39 }
0x14fa   :  { %v2223_v2 = vmul.f32 %v4678_v30, %v4674_v55  ;;  %4358 = vmatprep.subr.mxu1 %v4739_v39 }
0x14fc   :  { %4356 = vmatmul.mubr.msk.f32.vlgmr.msra.gmra.mrb[32].mxu1 %vm212_vm2, %v2223_v2 }
0x14fd   :  { %4360 = vmatprep.mubr.msk.f32.mxu1 %vm4740_vm1, %v4739_v39 }
0x1500   :  { %4359 = vmatpush3.xpose.msk.msra.mxu1 %vm212_vm2, %v2379_v60 }
0x1501   :  { %4363 = vmatprep.subr.mxu1 %v4739_v39 }
0x1503   :  { %4361 = vmatmul.mubr.msk.f32.vlgmr.msra.gmra.mrb[34].mxu1 %vm212_vm2, %v2377_v61 }
0x1504   :  { %4364 = vmatpush3.xpose.msk.msra.mxu1 %vm212_vm2, %v2457_v5  ;;  %4365 = vmatprep.mubr.msk.f32.mxu1 %vm4740_vm1, %v4739_v39 }
0x1505   :  { %4373 = vmatprep.subr.mxu1 %v4739_v39 }
0x1507   :  { %4366 = vmatmul.mubr.msk.f32.vlgmr.msra.gmra.mrb[36].mxu1 %vm212_vm2, %v2455_v26 }
0x1508   :  { %4375 = vmatprep.mubr.msk.f32.mxu1 %vm4740_vm1, %v4739_v39 }
0x15cb   :  { %v5273_v6 = vpop.f32.mrb[30].mxu1 }
0x15cc   :  { %v4352_v7 = vpop.f32.mrb[31].mxu1 }
0x15cf   :  { %v5275_v8 = vpop.f32.mrb[32].mxu1 }
0x15d0   :  { %v4357_v9 = vpop.f32.mrb[33].mxu1 }
0x15d6   :  { %v2450_v10 = vpop.f32.mrb[34].mxu1 }
0x15d7   :  { %v2451_v11 = vadd.f32 %v2450_v10, %v4923_v51  ;;  %v4362_v12 = vpop.f32.mrb[35].mxu1 }
0x15d9   :  { %v2532_v13 = vsel %vm212_vm2, %v2451_v11, -inf }
0x15da   :  { %2533 = vmax.xlane.f32.xlu0 %v2532_v13  ;;  %v2528_v14 = vpop.f32.mrb[36].mxu1 }
0x15db   :  { %v2529_v15 = vadd.f32 %v2528_v14, %v4923_v51  ;;  %v4367_v16 = vpop.f32.mrb[37].mxu1 }
0x15dd   :  { %v2535_v17 = vsel %vm212_vm2, %v2529_v15, -inf }
0x15de   :  { %2536 = vmax.xlane.f32.xlu1 %v2535_v17 }
0x15ef   :  { %2630 = vrot.lane.b32.xlu1 %v5217_v33, %s4746_s22 }
0x15f0   :  { %2554 = vrot.lane.b32.xlu0 %v5219_v35, %s4746_s22  ;;  %s5582_s22 = smov 8  }
0x15f3   :  { %2708 = vrot.lane.b32.xlu1 %v5219_v35, %s5576_s3 }
0x15f7   :  { %2786 = vrot.lane.b32.xlu1 %v5217_v33, %s5576_s3 }
0x15fb   :  { %2784 = vrot.lane.b32.xlu1 %v5217_v33, %s5577_s5 }
0x1667   :  { %v2534_v18 = vpop.xlane.xlu0 %2533 }
0x1668   :  { %v2538_v19 = vsub.f32 %v2451_v11, %v2534_v18 }
0x166a   :  { %v2540_v20 = vmul.f32 1.442695, %v2538_v19 }
0x166b   :  { %v2555_v21 = vpop.permute.xlu0 %2554  ;;  %v2537_v22 = vpop.xlane.xlu1 %2536 }
0x166c   :  { %4679 = vpow2.f32 %v2540_v20  ;;  %v2539_v23 = vsub.f32 %v2529_v15, %v2537_v22  ;;  %4369 = vmatpush3.msra.mxu0 %v2555_v21 }
0x166d   :  { %4378 = vmatprep.subr.mxu0 %v4739_v39 }
0x166e   :  { %v2542_v24 = vmul.f32 1.442695, %v2539_v23 }
0x166f   :  { %v2631_v25 = vpop.permute.xlu1 %2630 }
0x1670   :  { %4681 = vpow2.f32 %v2542_v24  ;;  %4374 = vmatpush3.msra.mxu1 %v2631_v25 }
0x1671   :  { %4383 = vmatprep.subr.mxu1 %v4739_v39 }
0x1673   :  { %v2709_v36 = vpop.permute.xlu1 %2708 }
0x1676   :  { %v4680_v27 = vpop.eup %4679 }
0x1677   :  { %v2544_v28 = vsel %vm212_vm2, %v4680_v27, 0.0  ;;  %v2787_v3 = vpop.permute.xlu1 %2786 }
0x1678   :  { %2545 = vadd.xlane.f32.xlu0 %v2544_v28 }
0x167a   :  { %v4682_v29 = vpop.eup %4681 }
0x167b   :  { %v2547_v31 = vsel %vm212_vm2, %v4682_v29, 0.0  ;;  %v2785_v43 = vpop.permute.xlu1 %2784 }
0x167c   :  { %2548 = vadd.xlane.f32.xlu0 %v2547_v31 }
0x1692   :  { %2706 = vrot.lane.b32.xlu0 %v5219_v35, %s5577_s5 }
0x1705   :  { %v2546_v32 = vpop.xlane.xlu0 %2545 }
0x1706   :  { %4683 = vrcp.f32 %v2546_v32 }
0x1709   :  { %v2549_v34 = vpop.xlane.xlu0 %2548 }
0x170a   :  { %4685 = vrcp.f32 %v2549_v34 }
0x170d   :  { %v2707_v41 = vpop.permute.xlu0 %2706 }
0x1710   :  { %v4684_v37 = vpop.eup %4683 }
0x1711   :  { %v2552_v4 = vmul.f32 %v4684_v37, %v4680_v27 }
0x1713   :  { %4371 = vmatmul.mubr.msk.f32.vlgmr.msra.gmra.mrb[16].mxu0 %vm212_vm2, %v2552_v4 }
0x1714   :  { %v4686_v38 = vpop.eup %4685  ;;  %4379 = vmatpush3.xpose.msk.msra.mxu0 %vm212_vm2, %v2709_v36  ;;  %4380 = vmatprep.mubr.msk.f32.mxu0 %vm4740_vm1, %v4739_v39 }
0x1715   :  { %v2553_v40 = vmul.f32 %v4686_v38, %v4682_v29  ;;  %4388 = vmatprep.subr.mxu0 %v4739_v39 }
0x1717   :  { %4376 = vmatmul.mubr.msk.f32.vlgmr.msra.gmra.mrb[38].mxu1 %vm212_vm2, %v2553_v40  ;;  %4381 = vmatmul.mubr.msk.f32.vlgmr.msra.gmra.mrb[18].mxu0 %vm212_vm2, %v2707_v41 }
0x1718   :  { %4384 = vmatpush3.xpose.msk.msra.mxu1 %vm212_vm2, %v2787_v3  ;;  %4385 = vmatprep.mubr.msk.f32.mxu1 %vm4740_vm1, %v4739_v39 }
0x1719   :  { %4393 = vmatprep.subr.mxu1 %v4739_v39  ;;  %4390 = vmatprep.mubr.msk.f32.mxu0 %vm4740_vm1, %v4739_v39 }
0x171b   :  { %4386 = vmatmul.mubr.msk.f32.vlgmr.msra.gmra.mrb[40].mxu1 %vm212_vm2, %v2785_v43 }
0x171c   :  { %4395 = vmatprep.mubr.msk.f32.mxu1 %vm4740_vm1, %v4739_v39 }
0x17e6   :  { %v5313_v45 = vpop.f32.mrb[16].mxu0 }
0x17e7   :  { %v4372_v46 = vpop.f32.mrb[17].mxu0 }
0x17ea   :  { %v5315_v47 = vpop.f32.mrb[38].mxu1  ;;  %v2780_v48 = vpop.f32.mrb[18].mxu0 }
0x17eb   :  { %v2781_v49 = vadd.f32 %v2780_v48, %v4923_v51  ;;  %v4377_v50 = vpop.f32.mrb[39].mxu1  ;;  %v4382_v52 = vpop.f32.mrb[19].mxu0 }
0x17ec   :  { %v3997_v52 = vld [vmem:[%s5534_s6 + $0x28] sm:$0xff] }
0x17ed   :  { %v2862_v53 = vsel %vm212_vm2, %v2781_v49, -inf }
0x17ee   :  { %2863 = vmax.xlane.f32.xlu0 %v2862_v53  ;;  %v2858_v54 = vpop.f32.mrb[40].mxu1 }
0x17ef   :  { %v2859_v42 = vadd.f32 %v2858_v54, %v4923_v51  ;;  %v4387_v55 = vpop.f32.mrb[41].mxu1  ;;  %v3998_v54 = vld [vmem:[%s5534_s6 + $0x30] sm:$0xff] }
0x17f1   :  { %v2865_v56 = vsel %vm212_vm2, %v2859_v42, -inf }
0x17f2   :  { %2866 = vmax.xlane.f32.xlu1 %v2865_v56 }
0x1803   :  { %2960 = vrot.lane.b32.xlu1 %v5217_v33, %s5578_s1 }
0x1804   :  { %2884 = vrot.lane.b32.xlu0 %v5219_v35, %s5578_s1 }
0x1807   :  { %3038 = vrot.lane.b32.xlu1 %v5219_v35, %s5579_s13 }
0x180b   :  { %3116 = vrot.lane.b32.xlu1 %v5217_v33, %s5579_s13 }
0x180f   :  { %3114 = vrot.lane.b32.xlu1 %v5217_v33, %s5580_s20 }
0x187b   :  { %v2864_v57 = vpop.xlane.xlu0 %2863 }
0x187c   :  { %v2868_v60 = vsub.f32 %v2781_v49, %v2864_v57 }
0x187e   :  { %v2870_v61 = vmul.f32 1.442695, %v2868_v60 }
0x187f   :  { %v2885_v62 = vpop.permute.xlu0 %2884  ;;  %v2867_v63 = vpop.xlane.xlu1 %2866 }
0x1880   :  { %4687 = vpow2.f32 %v2870_v61  ;;  %v2869_v0 = vsub.f32 %v2859_v42, %v2867_v63  ;;  %4389 = vmatpush3.msra.mxu0 %v2885_v62  ;;  %v3999_v42 = vld [vmem:[%s5534_s6 + $0x38] sm:$0xff] }
0x1881   :  { %4398 = vmatprep.subr.mxu0 %v4739_v39  ;;  %v4554_v55 = vpack.c.bf16 %v3999_v42, %v3998_v54  ;;  %v4018_v54 = vld [vmem:[%s5540_s12 + $0x90] sm:$0xff]  ;;  %v4019_v42 = vld [vmem:[%s5540_s12 + $0x98] sm:$0xff] }
0x1882   :  { %v2872_v44 = vmul.f32 1.442695, %v2869_v0 }
0x1883   :  { %v2961_v1 = vpop.permute.xlu1 %2960 }
0x1884   :  { %4689 = vpow2.f32 %v2872_v44  ;;  %4394 = vmatpush3.msra.mxu1 %v2961_v1 }
0x1885   :  { %4403 = vmatprep.subr.mxu1 %v4739_v39 }
0x1887   :  { %v3039_v10 = vpop.permute.xlu1 %3038 }
0x188a   :  { %v4688_v30 = vpop.eup %4687 }
0x188b   :  { %v2874_v2 = vsel %vm212_vm2, %v4688_v30, 0.0  ;;  %v3117_v14 = vpop.permute.xlu1 %3116 }
0x188c   :  { %2875 = vadd.xlane.f32.xlu0 %v2874_v2 }
0x188e   :  { %v4690_v5 = vpop.eup %4689 }
0x188f   :  { %v2877_v26 = vsel %vm212_vm2, %v4690_v5, 0.0  ;;  %v3115_v17 = vpop.permute.xlu1 %3114 }
0x1890   :  { %2878 = vadd.xlane.f32.xlu0 %v2877_v26 }
0x18a6   :  { %3036 = vrot.lane.b32.xlu0 %v5219_v35, %s5580_s20 }
0x1919   :  { %v2876_v7 = vpop.xlane.xlu0 %2875 }
0x191a   :  { %4691 = vrcp.f32 %v2876_v7 }
0x191d   :  { %v2879_v9 = vpop.xlane.xlu0 %2878 }
0x191e   :  { %4693 = vrcp.f32 %v2879_v9 }
0x1921   :  { %v3037_v16 = vpop.permute.xlu0 %3036 }
0x1924   :  { %v4692_v11 = vpop.eup %4691 }
0x1925   :  { %v2882_v12 = vmul.f32 %v4692_v11, %v4688_v30 }
0x1927   :  { %4391 = vmatmul.mubr.msk.f32.vlgmr.msra.gmra.mrb[20].mxu0 %vm212_vm2, %v2882_v12 }
0x1928   :  { %v4694_v13 = vpop.eup %4693  ;;  %4399 = vmatpush3.xpose.msk.msra.mxu0 %vm212_vm2, %v3039_v10  ;;  %4400 = vmatprep.mubr.msk.f32.mxu0 %vm4740_vm1, %v4739_v39 }
0x1929   :  { %v2883_v15 = vmul.f32 %v4694_v13, %v4690_v5  ;;  %4408 = vmatprep.subr.mxu0 %v4739_v39 }
0x192b   :  { %4396 = vmatmul.mubr.msk.f32.vlgmr.msra.gmra.mrb[42].mxu1 %vm212_vm2, %v2883_v15  ;;  %4401 = vmatmul.mubr.msk.f32.vlgmr.msra.gmra.mrb[22].mxu0 %vm212_vm2, %v3037_v16 }
0x192c   :  { %4404 = vmatpush3.xpose.msk.msra.mxu1 %vm212_vm2, %v3117_v14  ;;  %4405 = vmatprep.mubr.msk.f32.mxu1 %vm4740_vm1, %v4739_v39 }
0x192d   :  { %4413 = vmatprep.subr.mxu1 %v4739_v39  ;;  %4410 = vmatprep.mubr.msk.f32.mxu0 %vm4740_vm1, %v4739_v39 }
0x192f   :  { %4406 = vmatmul.mubr.msk.f32.vlgmr.msra.gmra.mrb[44].mxu1 %vm212_vm2, %v3115_v17 }
0x1930   :  { %4415 = vmatprep.mubr.msk.f32.mxu1 %vm4740_vm1, %v4739_v39 }
0x19fa   :  { %v2956_v18 = vpop.f32.mrb[20].mxu0 }
0x19fb   :  { %v4392_v19 = vpop.f32.mrb[21].mxu0 }
0x19fe   :  { %v3032_v20 = vpop.f32.mrb[42].mxu1  ;;  %v3110_v21 = vpop.f32.mrb[22].mxu0 }
0x19ff   :  { %v3111_v22 = vadd.f32 %v3110_v21, %v4923_v51  ;;  %v4397_v23 = vpop.f32.mrb[43].mxu1  ;;  %v4402_v24 = vpop.f32.mrb[23].mxu0 }
0x1a01   :  { %v3192_v25 = vsel %vm212_vm2, %v3111_v22, -inf }
0x1a02   :  { %3193 = vmax.xlane.f32.xlu0 %v3192_v25  ;;  %v3188_v27 = vpop.f32.mrb[44].mxu1 }
0x1a03   :  { %v3189_v28 = vadd.f32 %v3188_v27, %v4923_v51  ;;  %v4407_v29 = vpop.f32.mrb[45].mxu1  ;;  %v4008_v27 = vld [vmem:[%s5538_s10 + $0x20] sm:$0xff] }
0x1a05   :  { %v3195_v31 = vsel %vm212_vm2, %v3189_v28, -inf }
0x1a06   :  { %3196 = vmax.xlane.f32.xlu1 %v3195_v31  ;;  %v4010_v31 = vld [vmem:[%s5538_s10 + $0x30] sm:$0xff] }
0x1a17   :  { %3290 = vrot.lane.b32.xlu1 %v5217_v33, %s5581_s21 }
0x1a1b   :  { %3368 = vrot.lane.b32.xlu1 %v5313_v45, %s5582_s22 }
0x1a1f   :  { %3370 = vrot.lane.b32.xlu1 %v5315_v47, %s5582_s22 }
0x1a23   :  { %3378 = vrot.lane.b32.xlu1 %v3032_v20, %s5583_s24 }
0x1a8f   :  { %v3194_v32 = vpop.xlane.xlu0 %3193 }
0x1a90   :  { %v3198_v34 = vsub.f32 %v3111_v22, %v3194_v32  ;;  %v4011_v32 = vld [vmem:[%s5538_s10 + $0x38] sm:$0xff] }
0x1a92   :  { %v3200_v36 = vmul.f32 1.442695, %v3198_v34  ;;  %v4562_v34 = vpack.c.bf16 %v4011_v32, %v4010_v31 }
0x1a93   :  { %v3197_v37 = vpop.xlane.xlu1 %3196 }
0x1a94   :  { %4695 = vpow2.f32 %v3200_v36  ;;  %v3199_v51 = vsub.f32 %v3189_v28, %v3197_v37  ;;  %v4009_v28 = vld [vmem:[%s5538_s10 + $0x28] sm:$0xff]  ;;  %v4016_v36 = vld [vmem:[%s5540_s12 + $0x80] sm:$0xff] }
0x1a95   :  { %v4558_v29 = vpack.c.bf16 %v4009_v28, %v4008_v27  ;;  %v4017_v37 = vld [vmem:[%s5540_s12 + $0x88] sm:$0xff] }
0x1a96   :  { %v3202_v4 = vmul.f32 1.442695, %v3199_v51  ;;  %v4566_v51 = vpack.c.bf16 %v4017_v37, %v4016_v36  ;;  %v4033_v37 = vld [vmem:[%s5575_s23 + $0x1] ss:$0 sm:$0xff] }
0x1a97   :  { %v3291_v38 = vpop.permute.xlu1 %3290 }
0x1a98   :  { %4697 = vpow2.f32 %v3202_v4  ;;  %4414 = vmatpush3.msra.mxu1 %v3291_v38 }
0x1a99   :  { %4559 = vmatprep.subr.bf16.mxu1 %v4558_v29 }
0x1a9b   :  { %v3369_v62 = vpop.permute.xlu1 %3368 }
0x1a9c   :  { %v3390_v44 = vsel %vm212_vm2, %v5273_v6, %v3369_v62  ;;  %v4001_v6 = vld [vmem:[%s5535_s7 + $0x1] ss:$0 sm:$0xff] }
0x1a9e   :  { %v4696_v3 = vpop.eup %4695 }
0x1a9f   :  { %v3204_v33 = vsel %vm212_vm2, %v4696_v3, 0.0  ;;  %v3371_v63 = vpop.permute.xlu1 %3370 }
0x1aa0   :  { %3205 = vadd.xlane.f32.xlu0 %v3204_v33  ;;  %v3391_v26 = vsel %vm212_vm2, %v5275_v8, %v3371_v63  ;;  %v4024_v63 = vld [vmem:[%s5540_s12 + $0xc0] sm:$0xff] }
0x1aa2   :  { %v4698_v40 = vpop.eup %4697 }
0x1aa3   :  { %v3207_v41 = vsel %vm212_vm2, %v4698_v40, 0.0  ;;  %v3379_v1 = vpop.permute.xlu1 %3378 }
0x1aa4   :  { %3208 = vadd.xlane.f32.xlu0 %v3207_v41  ;;  %v3393_v7 = vsel %vm1554_vm5, %v3391_v26, %v3379_v1  ;;  %v4026_v1 = vld [vmem:[%s5540_s12 + $0xd0] sm:$0xff]  ;;  %v4029_v26 = vld [vmem:[%s5540_s12 + $0xe8] sm:$0xff] }
0x1aba   :  { %3214 = vrot.lane.b32.xlu0 %v5219_v35, %s5581_s21  ;;  %v3996_v35 = vld [vmem:[%s5534_s6 + $0x20] sm:$0xff] }
0x1abb   :  { %v4550_v53 = vpack.c.bf16 %v3997_v52, %v3996_v35 }
0x1abe   :  { %3376 = vrot.lane.b32.xlu0 %v2956_v18, %s5583_s24 }
0x1b2d   :  { %v3206_v43 = vpop.xlane.xlu0 %3205 }
0x1b2e   :  { %4699 = vrcp.f32 %v3206_v43 }
0x1b31   :  { %v3209_v45 = vpop.xlane.xlu0 %3208 }
0x1b32   :  { %4701 = vrcp.f32 %v3209_v45  ;;  %v4006_v45 = vld [vmem:[%s5536_s8 + $0x1] ss:$0 sm:$0xff] }
0x1b35   :  { %v3215_v46 = vpop.permute.xlu0 %3214 }
0x1b36   :  { %4409 = vmatpush3.msra.mxu0 %v3215_v46 }
0x1b37   :  { %4551 = vmatprep.subr.bf16.mxu0 %v4550_v53 }
0x1b38   :  { %v4700_v47 = vpop.eup %4699 }
0x1b39   :  { %v3212_v48 = vmul.f32 %v4700_v47, %v4696_v3  ;;  %v3377_v0 = vpop.permute.xlu0 %3376  ;;  %v4007_v47 = vld [vmem:[%s5537_s9 + $0x1] ss:$0 sm:$0xff] }
0x1b3a   :  { %v3392_v30 = vsel %vm1554_vm5, %v3390_v44, %v3377_v0  ;;  %v4025_v0 = vld [vmem:[%s5540_s12 + $0xc8] sm:$0xff] }
0x1b3b   :  { %4411 = vmatmul.mubr.msk.f32.vlgmr.msra.gmra.mrb[24].mxu0 %vm212_vm2, %v3212_v48  ;;  %v4582_v44 = vpack.c.bf16 %v4025_v0, %v4024_v63 }
0x1b3c   :  { %v4702_v49 = vpop.eup %4701  ;;  %4553 = vmatpush3.bf16.msra.mxu0 %v4550_v53 }
0x1b3d   :  { %v3213_v50 = vmul.f32 %v4702_v49, %v4698_v40  ;;  %4555 = vmatprep.subr.bf16.mxu0 %v4554_v55 }
0x1b3f   :  { %4416 = vmatmul.mubr.msk.f32.vlgmr.msra.gmra.mrb[46].mxu1 %vm212_vm2, %v3213_v50 }
0x1b40   :  { %4557 = vmatpush3.bf16.msra.mxu0 %v4554_v55  ;;  %4561 = vmatpush3.bf16.msra.mxu1 %v4558_v29  ;;  %v4570_v55 = vpack.c.bf16 %v4019_v42, %v4018_v54 }
0x1b41   :  { %4563 = vmatprep.subr.bf16.mxu1 %v4562_v34  ;;  %4567 = vmatprep.subr.bf16.mxu0 %v4566_v51 }
0x1b44   :  { %4565 = vmatpush3.bf16.msra.mxu1 %v4562_v34 }
0x1c0e   :  { %v3286_v56 = vpop.f32.mrb[24].mxu0 }
0x1c0f   :  { %3384 = vrot.lane.b32.xlu0 %v3286_v56, %s5584_s19  ;;  %v4412_v57 = vpop.f32.mrb[25].mxu0  ;;  %v4020_v56 = vld [vmem:[%s5540_s12 + $0xa0] sm:$0xff] }
0x1c10   :  { %v4021_v57 = vld [vmem:[%s5540_s12 + $0xa8] sm:$0xff] }
0x1c12   :  { %v3362_v60 = vpop.f32.mrb[46].mxu1 }
0x1c13   :  { %3386 = vrot.lane.b32.xlu1 %v3362_v60, %s5584_s19  ;;  %v4417_v61 = vpop.f32.mrb[47].mxu1  ;;  %v4022_v60 = vld [vmem:[%s5540_s12 + $0xb0] sm:$0xff] }
0x1c14   :  { %v4023_v61 = vld [vmem:[%s5540_s12 + $0xb8] sm:$0xff] }
0x1c15   :  { %v4578_v62 = vpack.c.bf16 %v4023_v61, %v4022_v60  ;;  %v3820_v60 = vld [vmem:[%s5544_s16 + $0x10] sm:$0xff]  ;;  %v3821_v61 = vld [vmem:[%s5544_s16 + $0x18] sm:$0xff] }
0x1c81   :  { %v3385_v2 = vpop.permute.xlu0 %3384 }
0x1c82   :  { %v3394_v5 = vsel %vm1557_vm4, %v3392_v30, %v3385_v2  ;;  %v4027_v30 = vld [vmem:[%s5540_s12 + $0xd8] sm:$0xff] }
0x1c83   :  { %4426 = vmatprep.mubr.msk.f32.mxu0 %vm73_vm0, %v3394_v5  ;;  %v4586_v2 = vpack.c.bf16 %v4027_v30, %v4026_v1  ;;  %v4028_v5 = vld [vmem:[%s5540_s12 + $0xe0] sm:$0xff] }
0x1c85   :  { %v3387_v9 = vpop.permute.xlu1 %3386 }
0x1c86   :  { %v3395_v10 = vsel %vm1557_vm4, %v3393_v7, %v3387_v9  ;;  %v4590_v7 = vpack.c.bf16 %v4029_v26, %v4028_v5  ;;  %v4030_v9 = vld [vmem:[%s5540_s12 + $0xf0] sm:$0xff] }
0x1c87   :  { %4427 = vmatmul.mubr.msk.f32.vlgmr.msra.gmra.mrb[26].mxu0 %vm73_vm0, %v3395_v10  ;;  %v4031_v10 = vld [vmem:[%s5540_s12 + $0xf8] sm:$0xff] }
0x1c88   :  { %4569 = vmatpush3.bf16.msra.mxu0 %v4566_v51 }
0x1c89   :  { %4571 = vmatprep.subr.bf16.mxu0 %v4570_v55 }
0x1c8c   :  { %4573 = vmatpush3.bf16.msra.mxu0 %v4570_v55  ;;  %v3818_v55 = vld [vmem:[%s5544_s16] sm:$0xff] }
0x1d5a   :  { %v4428_v11 = vpop.f32.mrb[26].mxu0 }
0x1d5b   :  { %v3487_v12 = vadd.f32 %v4428_v11, %v4001_v6  ;;  %v3481_v13 = vpop.f32.mrb[27].mxu0  ;;  %v4013_v11 = vld [vmem:[%s5539_s11 + $0x1] ss:$0 sm:$0xff] }
0x1d5c   :  { %v3482_v14 = vadd.f32 %v4001_v6, %v3481_v13  ;;  %v4594_v6 = vpack.c.bf16 %v4031_v10, %v4030_v9 }
0x1d5d   :  { %v5399_v15 = vadd.f32 %v3487_v12, %v5178_v58 }
0x1d5e   :  { %v5402_v8 = vadd.f32 %v3482_v14, %v5181_v59 }
0x1d5f   :  { %v3499_v16 = vsel %vm73_vm0, %v5399_v15, 0.0 }
0x1d60   :  { %3500 = vadd.xlane.f32.xlu1 %v3499_v16  ;;  %v3496_v17 = vsel %vm73_vm0, %v5402_v8, 0.0 }
0x1d61   :  { %3497 = vadd.xlane.f32.xlu0 %v3496_v17 }
0x1ded   :  { %v3501_v18 = vpop.xlane.xlu1 %3500 }
0x1dee   :  { %v3503_v19 = vmul.f32 0.03125, %v3501_v18  ;;  %v3498_v20 = vpop.xlane.xlu0 %3497 }
0x1def   :  { %v3502_v21 = vmul.f32 0.03125, %v3498_v20 }
0x1df0   :  { %v3505_v22 = vsub.f32 %v5399_v15, %v3503_v19 }
0x1df1   :  { %v3504_v58 = vsub.f32 %v5402_v8, %v3502_v21 }
0x1df2   :  { %v3507_v24 = vmul.f32 %v3505_v22, %v3505_v22 }
0x1df3   :  { %v3506_v23 = vmul.f32 %v3504_v58, %v3504_v58 }
0x1df4   :  { %v3511_v25 = vsel %vm73_vm0, %v3507_v24, 0.0 }
0x1df5   :  { %v3508_v59 = vsel %vm73_vm0, %v3506_v23, 0.0 }
0x1df6   :  { %3509 = vadd.xlane.f32.xlu0 %v3508_v59 }
0x1dfa   :  { %3512 = vadd.xlane.f32.xlu0 %v3511_v25 }
0x1e83   :  { %v3510_v4 = vpop.xlane.xlu0 %3509 }
0x1e84   :  { %v3514_v38 = vmul.f32 0.03125, %v3510_v4 }
0x1e86   :  { %v3516_v3 = vadd.f32 1e-05, %v3514_v38 }
0x1e87   :  { %v3513_v33 = vpop.xlane.xlu0 %3512 }
0x1e88   :  { %4703 = vrsqrt.f32 %v3516_v3  ;;  %v3515_v40 = vmul.f32 0.03125, %v3513_v33 }
0x1e8a   :  { %v3517_v41 = vadd.f32 1e-05, %v3515_v40 }
0x1e8c   :  { %4705 = vrsqrt.f32 %v3517_v41 }
0x1e92   :  { %v4704_v43 = vpop.eup %4703 }
0x1e93   :  { %v3520_v46 = vmul.f32 %v4704_v43, %v3504_v58 }
0x1e95   :  { %v3528_v48 = vmul.f32 %v4006_v45, %v3520_v46 }
0x1e96   :  { %v4706_v49 = vpop.eup %4705 }
0x1e97   :  { %v3521_v50 = vmul.f32 %v4706_v49, %v3505_v22  ;;  %v3536_v35 = vadd.f32 %v4007_v47, %v3528_v48 }
0x1e99   :  { %v3529_v52 = vmul.f32 %v4006_v45, %v3521_v50  ;;  %4437 = vmatprep.mubr.msk.f32.mxu1 %vm73_vm0, %v3536_v35 }
0x1e9b   :  { %v3537_v53 = vadd.f32 %v4007_v47, %v3529_v52 }
0x1e9d   :  { %4438 = vmatmul.mubr.msk.f32.vlgmr.msra.gmra.mrb[48].mxu1 %vm73_vm0, %v3537_v53 }
0x1e9e   :  { %4483 = vmatprep.mubr.msk.f32.mxu1 %vm4740_vm1, %v4739_v39  ;;  %v4574_v39 = vpack.c.bf16 %v4021_v57, %v4020_v56  ;;  %v3819_v56 = vld [vmem:[%s5544_s16 + $0x8] sm:$0xff] }
0x1e9f   :  { %v4599_v57 = vpack.c.bf16 %v3819_v56, %v3818_v55 }
0x1ea0   :  { %4575 = vmatprep.subr.bf16.mxu0 %v4574_v39 }
0x1ea1   :  { %4577 = vmatpush3.bf16.msra.mxu0 %v4574_v39  ;;  %v4756_v39 = vmov 0.0|0.0  }
0x1ea2   :  { %4579 = vmatprep.subr.bf16.mxu0 %v4578_v62  ;;  %4598 = vmatprep.subr.bf16.mxu1 %v4756_v39 }
0x1ea3   :  { %4600 = vmatpush3.bf16.msra.mxu1 %v4599_v57 }
0x1ea4   :  { %4601 = vmatprep.subr.bf16.mxu1 %v4756_v39 }
0x1ea5   :  { %4581 = vmatpush3.bf16.msra.mxu0 %v4578_v62  ;;  %v4602_v62 = vpack.c.bf16 %v3821_v61, %v3820_v60 }
0x1ea6   :  { %4583 = vmatprep.subr.bf16.mxu0 %v4582_v44 }
0x1ea7   :  { %4603 = vmatpush3.bf16.msra.mxu1 %v4602_v62 }
0x1ea9   :  { %4585 = vmatpush3.bf16.msra.mxu0 %v4582_v44 }
0x1eaa   :  { %4587 = vmatprep.subr.bf16.mxu0 %v4586_v2 }
0x1ead   :  { %4589 = vmatpush3.bf16.msra.mxu0 %v4586_v2 }
0x1eae   :  { %4591 = vmatprep.subr.bf16.mxu0 %v4590_v7 }
0x1eb1   :  { %4593 = vmatpush3.bf16.msra.mxu0 %v4590_v7  ;;  %v4034_v7 = vld [vmem:[%s5542_s14] ss:$0 sm:$0xff]  ;;  %s4757_s14 = smov [#allocation2]  }
0x1eb2   :  { %4595 = vmatprep.subr.bf16.mxu0 %v4594_v6  ;;  %s3914_s10 = sshll.u32 %s4757_s14, 4  ;;  %s3915_s10 = int_to_ptr.vmem [resolvable:$true] %s3914_s10 }
0x1eb3   :  { %p4720_p1 = scmp.lt.s32.totalorder %s3915_s10, %s3915_s10 }
0x1eb5   :  { %4597 = vmatpush3.bf16.msra.mxu0 %v4594_v6 }
0x1f70   :  { %v4439_v12 = vpop.f32.mrb[48].mxu1 }
0x1f71   :  { %v3629_v13 = vadd.f32 %v4439_v12, %v4013_v11  ;;  %v3623_v14 = vpop.f32.mrb[49].mxu1 }
0x1f72   :  { %v3624_v16 = vadd.f32 %v4013_v11, %v3623_v14  ;;  %v4035_v11 = vld [vmem:[%s5543_s15] ss:$0 sm:$0xff]  ;;  %s4715_s15 = scalar_lea.vmem %s3915_s10, 32 }
0x1f73   :  { %v3635_v17 = vmul.f32 0.044715, %v3629_v13  ;;  %v3633_v32 = vmul.f32 0.5, %v3629_v13  ;;  %p4716_p0 = scmp.ne.s32.totalorder %s3915_s10, %s4715_s15  ;;  %p4721_p2 = scmp.lt.s32.totalorder %s4715_s15, %s4715_s15 }
0x1f74   :  { %v3634_v18 = vmul.f32 0.044715, %v3624_v16  ;;  %v3632_v29 = vmul.f32 0.5, %v3624_v16 }
0x1f75   :  { %v3637_v19 = vmul.f32 %v3635_v17, %v3629_v13  ;;  %p4722_p3 = por %p4721_p2, %p4720_p1 }
0x1f76   :  { %v3636_v20 = vmul.f32 %v3634_v18, %v3624_v16 }
0x1f77   :  { %v3639_v21 = vmul.f32 %v3637_v19, %v3629_v13  ;;  %p4723_p4 = pnand %p4722_p3, %p4716_p0 }
0x1f78   :  { %v3638_v22 = vmul.f32 %v3636_v20, %v3624_v16  ;;  %v4036_v20 = vld [vmem:[%s5545_s17] ss:$0 sm:$0xff] }
0x1f79   :  { %v3641_v58 = vadd.f32 %v3639_v21, %v3629_v13 }
0x1f7a   :  { %v3640_v23 = vadd.f32 %v3638_v22, %v3624_v16 }
0x1f7b   :  { %v3643_v59 = vmul.f32 0.7978846, %v3641_v58 }
0x1f7c   :  { %v3642_v24 = vmul.f32 0.7978846, %v3640_v23 }
0x1f7d   :  { %4707 = vtanh.f32 %v3643_v59 }
0x1f7e   :  { %4709 = vtanh.f32 %v3642_v24 }
0x1f87   :  { %v4708_v25 = vpop.eup %4707 }
0x1f88   :  { %v4710_v27 = vpop.eup %4709  ;;  %v3647_v28 = vadd.f32 1.0, %v4708_v25 }
0x1f89   :  { %v3646_v31 = vadd.f32 1.0, %v4710_v27 }
0x1f8a   :  { %v3649_v36 = vmul.f32 %v3647_v28, %v3633_v32 }
0x1f8b   :  { %v3648_v34 = vmul.f32 %v3646_v31, %v3632_v29 }
0x1f8d   :  { %4472 = vmatprep.mubr.f32.mxu0 %v3648_v34 }
0x1f8e   :  { %4473 = vmatmul.mubr.f32.vlgmr.msra.gmra.mrb[28].mxu0 %v3649_v36 }
0x2061   :  { %v4474_v51 = vpop.f32.mrb[28].mxu0 }
0x2062   :  { %v3747_v4 = vadd.f32 %v4474_v51, %v4033_v37  ;;  %v3741_v38 = vpop.f32.mrb[29].mxu0 }
0x2063   :  { %v3742_v3 = vadd.f32 %v4033_v37, %v3741_v38 }
0x2064   :  { %v3751_v33 = vadd.f32 %v3747_v4, %v5399_v15 }
0x2065   :  { %v3750_v40 = vadd.f32 %v3742_v3, %v5402_v8 }
0x2066   :  { %v3756_v41 = vrot.slane %v3751_v33, 7 }
0x2067   :  { %v3760_v43 = vsel %vm3759_vm6, %v3750_v40, 0.0 }
0x2068   :  { %3761 = vadd.xlane.f32.xlu1 %v3760_v43  ;;  %v3764_v45 = vsel %vm3763_vm7, %v3756_v41, 0.0 }
0x2069   :  { %3765 = vadd.xlane.f32.xlu0 %v3764_v45 }
0x20f5   :  { %v3762_v46 = vpop.xlane.xlu1 %3761 }
0x20f6   :  { %v3767_v47 = vmul.f32 0.03125, %v3762_v46  ;;  %v3766_v48 = vpop.xlane.xlu0 %3765 }
0x20f7   :  { %v3768_v49 = vmul.f32 0.03125, %v3766_v48 }
0x20f8   :  { %v3774_v50 = vsub.f32 %v3750_v40, %v3767_v47 }
0x20f9   :  { %v3771_v35 = vrot.slane %v3768_v49, 1 }
0x20fa   :  { %v3776_v52 = vmul.f32 %v3774_v50, %v3774_v50 }
0x20fb   :  { %v3775_v53 = vsub.f32 %v3751_v33, %v3771_v35 }
0x20fc   :  { %v3783_v15 = vsel %vm3759_vm6, %v3776_v52, 0.0 }
0x20fd   :  { %3784 = vadd.xlane.f32.xlu1 %v3783_v15  ;;  %v3777_v8 = vmul.f32 %v3775_v53, %v3775_v53 }
0x20ff   :  { %v3780_v54 = vrot.slane %v3777_v8, 7 }
0x2101   :  { %v3786_v42 = vsel %vm3763_vm7, %v3780_v54, 0.0 }
0x2102   :  { %3787 = vadd.xlane.f32.xlu0 %v3786_v42 }
0x218a   :  { %v3785_v63 = vpop.xlane.xlu1 %3784 }
0x218b   :  { %v3789_v0 = vmul.f32 0.03125, %v3785_v63 }
0x218d   :  { %v3791_v44 = vadd.f32 1e-05, %v3789_v0 }
0x218f   :  { %4711 = vrsqrt.f32 %v3791_v44  ;;  %v3788_v1 = vpop.xlane.xlu0 %3787 }
0x2190   :  { %v3790_v30 = vmul.f32 0.03125, %v3788_v1 }
0x2192   :  { %v3792_v2 = vadd.f32 1e-05, %v3790_v30 }
0x2194   :  { %4713 = vrsqrt.f32 %v3792_v2 }
0x2199   :  { %v4712_v5 = vpop.eup %4711 }
0x219a   :  { %v3800_v26 = vmul.f32 %v4712_v5, %v3774_v50 }
0x219c   :  { %v3808_v6 = vmul.f32 %v4034_v7, %v3800_v26 }
0x219e   :  { %v4714_v9 = vpop.eup %4713  ;;  %v3816_v14 = vadd.f32 %v4035_v11, %v3808_v6 }
0x219f   :  { %v3797_v10 = vrot.slane %v4714_v9, 1 }
0x21a0   :  { %v3831_v18 = vrot.slane %v3816_v14, 7 }
0x21a1   :  { %v3801_v12 = vmul.f32 %v3797_v10, %v3775_v53 }
0x21a3   :  { %v3809_v13 = vmul.f32 %v4034_v7, %v3801_v12 }
0x21a5   :  { %v3817_v16 = vadd.f32 %v4035_v11, %v3809_v13 }
0x21a7   :  { %v3832_v17 = vrot.slane %v3817_v16, 6 }
0x21a9   :  { %v3834_v19 = vsel %vm3833_vm8, %v3832_v17, %v3831_v18 }
0x21aa   :  { %4484 = vmatmul.mubr.msk.f32.vlgmr.msra.gmra.mrb[50].mxu1 %vm73_vm0, %v3834_v19 }
0x227d   :  { %v3903_v21 = vpop.f32.mrb[50].mxu1 }
0x227e   :  { %v3904_v22 = vadd.f32 %v4036_v20, %v3903_v21  ;;  %v4485_v58 = vpop.f32.mrb[51].mxu1 }
0x2280   :  { %3907 = vst [vmem:[#allocation2] sm:$0x3] %v3904_v22 }
0x2281   :  { %4726 = shalt.err (!%p4723_p4)
}
0x2282   :  { %s4727_s30 = scalar_lea.hbm %s5546_s18, 32 }
0x2283   :  { %p4728_p5 = scmp.ne.s32.totalorder %s5546_s18, %s4727_s30  ;;  %p4731_p6 = scmp.lt.u32.totalorder %s4727_s30, %s5546_s18 }
0x2285   :  { %p4733_p7 = pnand %p4731_p6, %p4728_p5 }
0x2287   :  { %4736 = shalt.err (!%p4733_p7)
}
0x2288   :  { %3917 = dma.vmem_to_hbm [thread:$0]  %s3915_s10, 32, %s5546_s18, [#allocation3]  }
0x2289   :  { %4737 = dma.done.wait [#allocation3], 32  }
0x228a   :  { %4738 = vsyncadd [#allocation3], 4294967264 }
0x228b   :  { %3921 = vsyncpa [#allocation3], 1 }

</bundles_post_ra>
